<compile_context>
chip_gen: v6e
topology: v6e:2x2x1
jax: 0.10.0
libtpu: 0.0.40
codegen_flags: <defaults>
</compile_context>

<pallas_src>
import functools

import jax
import jax.numpy as jnp
from jax import lax
from jax.experimental import pallas as pl
from jax.experimental.pallas import tpu as pltpu


# ---------------------------------------------------------------------------
# Fused kernel: conv stack + ReLU + flatten + dense, one batch element per step
# ---------------------------------------------------------------------------
def _timesnet_kernel(*refs, num_layers, L):
    x_ref = refs[0]
    conv_refs = refs[1:1 + 2 * num_layers]          # (w0, b0, w1, b1, ...)
    wd_ref = refs[1 + 2 * num_layers]               # (L, 64, out_len)
    bd_ref = refs[2 + 2 * num_layers]               # (1, out_len)
    o_ref = refs[3 + 2 * num_layers]                # (1, 1, out_len)

    # (L, L) shift matrices; missing boundary rows == Conv1d zero padding.
    r = lax.broadcasted_iota(jnp.int32, (L, L), 0)
    c = lax.broadcasted_iota(jnp.int32, (L, L), 1)
    s_prev = jnp.where(c == r - 1, 1.0, 0.0).astype(jnp.float32)   # row t <- x[t-1]
    s_next = jnp.where(c == r + 1, 1.0, 0.0).astype(jnp.float32)   # row t <- x[t+1]

    h = x_ref[0]                                    # (L, C_in) time-major
    for i in range(num_layers):
        w_ref = conv_refs[2 * i]                    # (3, C_in_i, 64)
        b = conv_refs[2 * i + 1][...]               # (1, 64)
        h_prev = jnp.dot(s_prev, h, preferred_element_type=jnp.float32)
        h_next = jnp.dot(s_next, h, preferred_element_type=jnp.float32)
        y = (jnp.dot(h_prev, w_ref[0], preferred_element_type=jnp.float32)
             + jnp.dot(h,      w_ref[1], preferred_element_type=jnp.float32)
             + jnp.dot(h_next, w_ref[2], preferred_element_type=jnp.float32)
             + b)
        h = jnp.maximum(y, 0.0)                     # (L, 64)

    # Flatten + Linear fused: out = bias + sum_t h[t, :] @ Wd[t, :, :]
    acc = bd_ref[...]                               # (1, out_len)
    for t in range(L):                              # L is small & static -> unrolled
        acc = acc + jnp.dot(h[t:t + 1, :], wd_ref[t],
                            preferred_element_type=jnp.float32)
    o_ref[0] = acc


def timesnet_forward(x, params):
    """x: (B, L, input_features) f32  ->  (B, output_length) f32."""
    B, L, c_in = x.shape
    conv_ws = params["conv_w"]                      # list of (3, C_in_i, 64)
    conv_bs = params["conv_b"]                      # list of (1, 64)
    wd = params["dense_w"]                          # (L, 64, out_len)
    bd = params["dense_b"]                          # (1, out_len)
    num_layers = len(conv_ws)
    out_len = wd.shape[-1]

    in_specs = [pl.BlockSpec((1, L, c_in), lambda b: (b, 0, 0))]
    operands = [x]
    for w, bias in zip(conv_ws, conv_bs):
        in_specs.append(pl.BlockSpec(w.shape, lambda b: (0, 0, 0)))
        in_specs.append(pl.BlockSpec(bias.shape, lambda b: (0, 0)))
        operands += [w, bias]
    in_specs.append(pl.BlockSpec(wd.shape, lambda b: (0, 0, 0)))
    in_specs.append(pl.BlockSpec(bd.shape, lambda b: (0, 0)))
    operands += [wd, bd]

    out = pl.pallas_call(
        functools.partial(_timesnet_kernel, num_layers=num_layers, L=L),
        grid=(B,),
        in_specs=in_specs,
        out_specs=pl.BlockSpec((1, 1, out_len), lambda b: (b, 0, 0)),
        out_shape=jax.ShapeDtypeStruct((B, 1, out_len), jnp.float32),
        compiler_params=pltpu.CompilerParams(dimension_semantics=("parallel",)),
    )(*operands)
    return out.reshape(B, out_len)


# ---------------------------------------------------------------------------
# Parameters: generated in PyTorch layout, then converted to kernel layout
# ---------------------------------------------------------------------------
def init_pt_params(key, input_features, seq_len, output_length,
                   num_layers=4, hidden=64):
    keys = iter(jax.random.split(key, 4 * num_layers + 4))

    def unif(shape, fan_in):
        bound = 1.0 / (fan_in ** 0.5)
        return jax.random.uniform(next(keys), shape, jnp.float32, -bound, bound)

    conv_w, conv_b = [], []
    for i in range(num_layers):
        cin = input_features if i == 0 else hidden
        conv_w.append(unif((hidden, cin, 3), cin * 3))        # Conv1d weight (Cout, Cin, K)
        conv_b.append(unif((hidden,), cin * 3))
    dense_w = unif((output_length, hidden * seq_len), hidden * seq_len)  # Linear weight
    dense_b = unif((output_length,), hidden * seq_len)
    return dict(conv_w=conv_w, conv_b=conv_b, dense_w=dense_w, dense_b=dense_b)


def convert_params(pt, seq_len, hidden=64):
    out_len = pt["dense_w"].shape[0]
    conv_w = [jnp.transpose(w, (2, 1, 0)) for w in pt["conv_w"]]   # (3, Cin, Cout)
    conv_b = [b.reshape(1, -1) for b in pt["conv_b"]]              # (1, 64)
    # PyTorch flattens (B, C, L) -> column index c*L + t ; kernel wants (t, c, o).
    dense_w = pt["dense_w"].reshape(out_len, hidden, seq_len).transpose(2, 1, 0)
    dense_b = pt["dense_b"].reshape(1, -1)
    return dict(conv_w=conv_w, conv_b=conv_b, dense_w=dense_w, dense_b=dense_b)


def ref_forward(x, pt):
    """Pure-JAX reference matching the PyTorch module exactly."""
    h = jnp.transpose(x, (0, 2, 1))                 # (B, C_in, L)  == x.permute(0,2,1)
    for w, b in zip(pt["conv_w"], pt["conv_b"]):
        h = lax.conv_general_dilated(
            h, w, window_strides=(1,), padding=[(1, 1)],
            dimension_numbers=("NCH", "OIH", "NCH"),
            precision=lax.Precision.HIGHEST)
        h = jnp.maximum(h + b[None, :, None], 0.0)
    hf = h.reshape(h.shape[0], -1)                  # channel-major flatten
    return jnp.dot(hf, pt["dense_w"].T, precision=lax.Precision.HIGHEST) + pt["dense_b"]


if __name__ == "__main__":
    B, input_features, seq_len, output_length, num_layers = 2, 4, 16, 8, 4

    kx, kp = jax.random.split(jax.random.PRNGKey(0))
    x = jax.random.normal(kx, (B, seq_len, input_features), jnp.float32)
    pt_params = init_pt_params(kp, input_features, seq_len, output_length, num_layers)
    params = convert_params(pt_params, seq_len)

    fwd = jax.jit(timesnet_forward)
    out = fwd(x, params)
    jax.block_until_ready(out)
    assert out.shape == (B, output_length), out.shape
    assert bool(jnp.all(jnp.isfinite(out)))

    ref = ref_forward(x, pt_params)
    err = float(jnp.max(jnp.abs(out - ref)))
    assert err < 2e-2, f"mismatch vs reference: max abs err = {err}"
    print("KERNEL_OK")
</pallas_src>

<mosaic_0001>
module attributes {stable_mosaic.version = 11 : i64} {
  func.func @_timesnet_kernel(%arg0: i32, %arg1: memref<1x16x4xf32, #tpu.memory_space<vmem>>, %arg2: memref<3x4x64xf32, #tpu.memory_space<vmem>>, %arg3: memref<1x64xf32, #tpu.memory_space<vmem>>, %arg4: memref<3x64x64xf32, #tpu.memory_space<vmem>>, %arg5: memref<1x64xf32, #tpu.memory_space<vmem>>, %arg6: memref<3x64x64xf32, #tpu.memory_space<vmem>>, %arg7: memref<1x64xf32, #tpu.memory_space<vmem>>, %arg8: memref<3x64x64xf32, #tpu.memory_space<vmem>>, %arg9: memref<1x64xf32, #tpu.memory_space<vmem>>, %arg10: memref<16x64x8xf32, #tpu.memory_space<vmem>>, %arg11: memref<1x8xf32, #tpu.memory_space<vmem>>, %arg12: memref<1x1x8xf32, #tpu.memory_space<vmem>>) attributes {dimension_semantics = [#tpu.dimension_semantics<parallel>], iteration_bounds = array<i64: 2>, scalar_prefetch = 0 : i64, scratch_operands = 0 : i64, tpu.core_type = #tpu.core_type<tc>, window_params = [{transform_indices = @transform_0, window_bounds = array<i64: 1, 16, 4>}, {pipeline_mode = #tpu.pipeline_mode<synchronous>, transform_indices = @transform_1, window_bounds = array<i64: 3, 4, 64>}, {pipeline_mode = #tpu.pipeline_mode<synchronous>, transform_indices = @transform_2, window_bounds = array<i64: 1, 64>}, {pipeline_mode = #tpu.pipeline_mode<synchronous>, transform_indices = @transform_3, window_bounds = array<i64: 3, 64, 64>}, {pipeline_mode = #tpu.pipeline_mode<synchronous>, transform_indices = @transform_4, window_bounds = array<i64: 1, 64>}, {pipeline_mode = #tpu.pipeline_mode<synchronous>, transform_indices = @transform_5, window_bounds = array<i64: 3, 64, 64>}, {pipeline_mode = #tpu.pipeline_mode<synchronous>, transform_indices = @transform_6, window_bounds = array<i64: 1, 64>}, {pipeline_mode = #tpu.pipeline_mode<synchronous>, transform_indices = @transform_7, window_bounds = array<i64: 3, 64, 64>}, {pipeline_mode = #tpu.pipeline_mode<synchronous>, transform_indices = @transform_8, window_bounds = array<i64: 1, 64>}, {pipeline_mode = #tpu.pipeline_mode<synchronous>, transform_indices = @transform_9, window_bounds = array<i64: 16, 64, 8>}, {pipeline_mode = #tpu.pipeline_mode<synchronous>, transform_indices = @transform_10, window_bounds = array<i64: 1, 8>}, {transform_indices = @transform_11, window_bounds = array<i64: 1, 1, 8>}]} {
    %0 = tpu.iota {dimensions = array<i32: 0>} : vector<16x16xi32>
    %1 = tpu.iota {dimensions = array<i32: 1>} : vector<16x16xi32>
    %c1_i32 = arith.constant 1 : i32
    %2 = vector.broadcast %c1_i32 : i32 to vector<16x16xi32>
    %3 = arith.subi %0, %2 : vector<16x16xi32>
    %4 = arith.cmpi eq, %1, %3 : vector<16x16xi32>
    %cst = arith.constant 1.000000e+00 : f32
    %cst_0 = arith.constant 0.000000e+00 : f32
    %5 = vector.broadcast %cst : f32 to vector<16x16xf32>
    %6 = vector.broadcast %cst_0 : f32 to vector<16x16xf32>
    %7 = arith.select %4, %5, %6 : vector<16x16xi1>, vector<16x16xf32>
    %c1_i32_1 = arith.constant 1 : i32
    %8 = vector.broadcast %c1_i32_1 : i32 to vector<16x16xi32>
    %9 = arith.addi %0, %8 : vector<16x16xi32>
    %10 = arith.cmpi eq, %1, %9 : vector<16x16xi32>
    %cst_2 = arith.constant 1.000000e+00 : f32
    %cst_3 = arith.constant 0.000000e+00 : f32
    %11 = vector.broadcast %cst_2 : f32 to vector<16x16xf32>
    %12 = vector.broadcast %cst_3 : f32 to vector<16x16xf32>
    %13 = arith.select %10, %11, %12 : vector<16x16xi1>, vector<16x16xf32>
    %c0 = arith.constant 0 : index
    %c0_4 = arith.constant 0 : index
    %c0_5 = arith.constant 0 : index
    %14 = vector.load %arg1[%c0, %c0_4, %c0_5] : memref<1x16x4xf32, #tpu.memory_space<vmem>>, vector<1x16x4xf32>
    %15 = vector.shape_cast %14 : vector<1x16x4xf32> to vector<16x4xf32>
    %c0_6 = arith.constant 0 : index
    %c0_7 = arith.constant 0 : index
    %16 = vector.load %arg3[%c0_6, %c0_7] : memref<1x64xf32, #tpu.memory_space<vmem>>, vector<1x64xf32>
    %cst_8 = arith.constant dense<0.000000e+00> : vector<16x4xf32>
    %17 = tpu.matmul %7, %15, %cst_8 {dimension_numbers = #tpu.dot_dimension_numbers<[1], [0], [0], [1], [0, 0, 1, 1], [], []>} : vector<16x16xf32>, vector<16x4xf32>, vector<16x4xf32> -> vector<16x4xf32>
    %cst_9 = arith.constant dense<0.000000e+00> : vector<16x4xf32>
    %18 = tpu.matmul %13, %15, %cst_9 {dimension_numbers = #tpu.dot_dimension_numbers<[1], [0], [0], [1], [0, 0, 1, 1], [], []>} : vector<16x16xf32>, vector<16x4xf32>, vector<16x4xf32> -> vector<16x4xf32>
    %c0_10 = arith.constant 0 : index
    %c0_11 = arith.constant 0 : index
    %c0_12 = arith.constant 0 : index
    %19 = vector.load %arg2[%c0_10, %c0_11, %c0_12] : memref<3x4x64xf32, #tpu.memory_space<vmem>>, vector<1x4x64xf32>
    %20 = vector.shape_cast %19 : vector<1x4x64xf32> to vector<4x64xf32>
    %cst_13 = arith.constant dense<0.000000e+00> : vector<16x64xf32>
    %21 = tpu.matmul %17, %20, %cst_13 {dimension_numbers = #tpu.dot_dimension_numbers<[1], [0], [0], [1], [0, 0, 1, 1], [], []>} : vector<16x4xf32>, vector<4x64xf32>, vector<16x64xf32> -> vector<16x64xf32>
    %c1 = arith.constant 1 : index
    %c0_14 = arith.constant 0 : index
    %c0_15 = arith.constant 0 : index
    %22 = vector.load %arg2[%c1, %c0_14, %c0_15] : memref<3x4x64xf32, #tpu.memory_space<vmem>>, vector<1x4x64xf32>
    %23 = vector.shape_cast %22 : vector<1x4x64xf32> to vector<4x64xf32>
    %cst_16 = arith.constant dense<0.000000e+00> : vector<16x64xf32>
    %24 = tpu.matmul %15, %23, %cst_16 {dimension_numbers = #tpu.dot_dimension_numbers<[1], [0], [0], [1], [0, 0, 1, 1], [], []>} : vector<16x4xf32>, vector<4x64xf32>, vector<16x64xf32> -> vector<16x64xf32>
    %25 = arith.addf %21, %24 : vector<16x64xf32>
    %c2 = arith.constant 2 : index
    %c0_17 = arith.constant 0 : index
    %c0_18 = arith.constant 0 : index
    %26 = vector.load %arg2[%c2, %c0_17, %c0_18] : memref<3x4x64xf32, #tpu.memory_space<vmem>>, vector<1x4x64xf32>
    %27 = vector.shape_cast %26 : vector<1x4x64xf32> to vector<4x64xf32>
    %cst_19 = arith.constant dense<0.000000e+00> : vector<16x64xf32>
    %28 = tpu.matmul %18, %27, %cst_19 {dimension_numbers = #tpu.dot_dimension_numbers<[1], [0], [0], [1], [0, 0, 1, 1], [], []>} : vector<16x4xf32>, vector<4x64xf32>, vector<16x64xf32> -> vector<16x64xf32>
    %29 = arith.addf %25, %28 : vector<16x64xf32>
    %30 = vector.broadcast %16 : vector<1x64xf32> to vector<16x64xf32>
    %31 = arith.addf %29, %30 : vector<16x64xf32>
    %cst_20 = arith.constant 0.000000e+00 : f32
    %32 = vector.broadcast %cst_20 : f32 to vector<16x64xf32>
    %33 = arith.maximumf %31, %32 : vector<16x64xf32>
    %c0_21 = arith.constant 0 : index
    %c0_22 = arith.constant 0 : index
    %34 = vector.load %arg5[%c0_21, %c0_22] : memref<1x64xf32, #tpu.memory_space<vmem>>, vector<1x64xf32>
    %cst_23 = arith.constant dense<0.000000e+00> : vector<16x64xf32>
    %35 = tpu.matmul %7, %33, %cst_23 {dimension_numbers = #tpu.dot_dimension_numbers<[1], [0], [0], [1], [0, 0, 1, 1], [], []>} : vector<16x16xf32>, vector<16x64xf32>, vector<16x64xf32> -> vector<16x64xf32>
    %cst_24 = arith.constant dense<0.000000e+00> : vector<16x64xf32>
    %36 = tpu.matmul %13, %33, %cst_24 {dimension_numbers = #tpu.dot_dimension_numbers<[1], [0], [0], [1], [0, 0, 1, 1], [], []>} : vector<16x16xf32>, vector<16x64xf32>, vector<16x64xf32> -> vector<16x64xf32>
    %c0_25 = arith.constant 0 : index
    %c0_26 = arith.constant 0 : index
    %c0_27 = arith.constant 0 : index
    %37 = vector.load %arg4[%c0_25, %c0_26, %c0_27] : memref<3x64x64xf32, #tpu.memory_space<vmem>>, vector<1x64x64xf32>
    %38 = vector.shape_cast %37 : vector<1x64x64xf32> to vector<64x64xf32>
    %cst_28 = arith.constant dense<0.000000e+00> : vector<16x64xf32>
    %39 = tpu.matmul %35, %38, %cst_28 {dimension_numbers = #tpu.dot_dimension_numbers<[1], [0], [0], [1], [0, 0, 1, 1], [], []>} : vector<16x64xf32>, vector<64x64xf32>, vector<16x64xf32> -> vector<16x64xf32>
    %c1_29 = arith.constant 1 : index
    %c0_30 = arith.constant 0 : index
    %c0_31 = arith.constant 0 : index
    %40 = vector.load %arg4[%c1_29, %c0_30, %c0_31] : memref<3x64x64xf32, #tpu.memory_space<vmem>>, vector<1x64x64xf32>
    %41 = vector.shape_cast %40 : vector<1x64x64xf32> to vector<64x64xf32>
    %cst_32 = arith.constant dense<0.000000e+00> : vector<16x64xf32>
    %42 = tpu.matmul %33, %41, %cst_32 {dimension_numbers = #tpu.dot_dimension_numbers<[1], [0], [0], [1], [0, 0, 1, 1], [], []>} : vector<16x64xf32>, vector<64x64xf32>, vector<16x64xf32> -> vector<16x64xf32>
    %43 = arith.addf %39, %42 : vector<16x64xf32>
    %c2_33 = arith.constant 2 : index
    %c0_34 = arith.constant 0 : index
    %c0_35 = arith.constant 0 : index
    %44 = vector.load %arg4[%c2_33, %c0_34, %c0_35] : memref<3x64x64xf32, #tpu.memory_space<vmem>>, vector<1x64x64xf32>
    %45 = vector.shape_cast %44 : vector<1x64x64xf32> to vector<64x64xf32>
    %cst_36 = arith.constant dense<0.000000e+00> : vector<16x64xf32>
    %46 = tpu.matmul %36, %45, %cst_36 {dimension_numbers = #tpu.dot_dimension_numbers<[1], [0], [0], [1], [0, 0, 1, 1], [], []>} : vector<16x64xf32>, vector<64x64xf32>, vector<16x64xf32> -> vector<16x64xf32>
    %47 = arith.addf %43, %46 : vector<16x64xf32>
    %48 = vector.broadcast %34 : vector<1x64xf32> to vector<16x64xf32>
    %49 = arith.addf %47, %48 : vector<16x64xf32>
    %cst_37 = arith.constant 0.000000e+00 : f32
    %50 = vector.broadcast %cst_37 : f32 to vector<16x64xf32>
    %51 = arith.maximumf %49, %50 : vector<16x64xf32>
    %c0_38 = arith.constant 0 : index
    %c0_39 = arith.constant 0 : index
    %52 = vector.load %arg7[%c0_38, %c0_39] : memref<1x64xf32, #tpu.memory_space<vmem>>, vector<1x64xf32>
    %cst_40 = arith.constant dense<0.000000e+00> : vector<16x64xf32>
    %53 = tpu.matmul %7, %51, %cst_40 {dimension_numbers = #tpu.dot_dimension_numbers<[1], [0], [0], [1], [0, 0, 1, 1], [], []>} : vector<16x16xf32>, vector<16x64xf32>, vector<16x64xf32> -> vector<16x64xf32>
    %cst_41 = arith.constant dense<0.000000e+00> : vector<16x64xf32>
    %54 = tpu.matmul %13, %51, %cst_41 {dimension_numbers = #tpu.dot_dimension_numbers<[1], [0], [0], [1], [0, 0, 1, 1], [], []>} : vector<16x16xf32>, vector<16x64xf32>, vector<16x64xf32> -> vector<16x64xf32>
    %c0_42 = arith.constant 0 : index
    %c0_43 = arith.constant 0 : index
    %c0_44 = arith.constant 0 : index
    %55 = vector.load %arg6[%c0_42, %c0_43, %c0_44] : memref<3x64x64xf32, #tpu.memory_space<vmem>>, vector<1x64x64xf32>
    %56 = vector.shape_cast %55 : vector<1x64x64xf32> to vector<64x64xf32>
    %cst_45 = arith.constant dense<0.000000e+00> : vector<16x64xf32>
    %57 = tpu.matmul %53, %56, %cst_45 {dimension_numbers = #tpu.dot_dimension_numbers<[1], [0], [0], [1], [0, 0, 1, 1], [], []>} : vector<16x64xf32>, vector<64x64xf32>, vector<16x64xf32> -> vector<16x64xf32>
    %c1_46 = arith.constant 1 : index
    %c0_47 = arith.constant 0 : index
    %c0_48 = arith.constant 0 : index
    %58 = vector.load %arg6[%c1_46, %c0_47, %c0_48] : memref<3x64x64xf32, #tpu.memory_space<vmem>>, vector<1x64x64xf32>
    %59 = vector.shape_cast %58 : vector<1x64x64xf32> to vector<64x64xf32>
    %cst_49 = arith.constant dense<0.000000e+00> : vector<16x64xf32>
    %60 = tpu.matmul %51, %59, %cst_49 {dimension_numbers = #tpu.dot_dimension_numbers<[1], [0], [0], [1], [0, 0, 1, 1], [], []>} : vector<16x64xf32>, vector<64x64xf32>, vector<16x64xf32> -> vector<16x64xf32>
    %61 = arith.addf %57, %60 : vector<16x64xf32>
    %c2_50 = arith.constant 2 : index
    %c0_51 = arith.constant 0 : index
    %c0_52 = arith.constant 0 : index
    %62 = vector.load %arg6[%c2_50, %c0_51, %c0_52] : memref<3x64x64xf32, #tpu.memory_space<vmem>>, vector<1x64x64xf32>
    %63 = vector.shape_cast %62 : vector<1x64x64xf32> to vector<64x64xf32>
    %cst_53 = arith.constant dense<0.000000e+00> : vector<16x64xf32>
    %64 = tpu.matmul %54, %63, %cst_53 {dimension_numbers = #tpu.dot_dimension_numbers<[1], [0], [0], [1], [0, 0, 1, 1], [], []>} : vector<16x64xf32>, vector<64x64xf32>, vector<16x64xf32> -> vector<16x64xf32>
    %65 = arith.addf %61, %64 : vector<16x64xf32>
    %66 = vector.broadcast %52 : vector<1x64xf32> to vector<16x64xf32>
    %67 = arith.addf %65, %66 : vector<16x64xf32>
    %cst_54 = arith.constant 0.000000e+00 : f32
    %68 = vector.broadcast %cst_54 : f32 to vector<16x64xf32>
    %69 = arith.maximumf %67, %68 : vector<16x64xf32>
    %c0_55 = arith.constant 0 : index
    %c0_56 = arith.constant 0 : index
    %70 = vector.load %arg9[%c0_55, %c0_56] : memref<1x64xf32, #tpu.memory_space<vmem>>, vector<1x64xf32>
    %cst_57 = arith.constant dense<0.000000e+00> : vector<16x64xf32>
    %71 = tpu.matmul %7, %69, %cst_57 {dimension_numbers = #tpu.dot_dimension_numbers<[1], [0], [0], [1], [0, 0, 1, 1], [], []>} : vector<16x16xf32>, vector<16x64xf32>, vector<16x64xf32> -> vector<16x64xf32>
    %cst_58 = arith.constant dense<0.000000e+00> : vector<16x64xf32>
    %72 = tpu.matmul %13, %69, %cst_58 {dimension_numbers = #tpu.dot_dimension_numbers<[1], [0], [0], [1], [0, 0, 1, 1], [], []>} : vector<16x16xf32>, vector<16x64xf32>, vector<16x64xf32> -> vector<16x64xf32>
    %c0_59 = arith.constant 0 : index
    %c0_60 = arith.constant 0 : index
    %c0_61 = arith.constant 0 : index
    %73 = vector.load %arg8[%c0_59, %c0_60, %c0_61] : memref<3x64x64xf32, #tpu.memory_space<vmem>>, vector<1x64x64xf32>
    %74 = vector.shape_cast %73 : vector<1x64x64xf32> to vector<64x64xf32>
    %cst_62 = arith.constant dense<0.000000e+00> : vector<16x64xf32>
    %75 = tpu.matmul %71, %74, %cst_62 {dimension_numbers = #tpu.dot_dimension_numbers<[1], [0], [0], [1], [0, 0, 1, 1], [], []>} : vector<16x64xf32>, vector<64x64xf32>, vector<16x64xf32> -> vector<16x64xf32>
    %c1_63 = arith.constant 1 : index
    %c0_64 = arith.constant 0 : index
    %c0_65 = arith.constant 0 : index
    %76 = vector.load %arg8[%c1_63, %c0_64, %c0_65] : memref<3x64x64xf32, #tpu.memory_space<vmem>>, vector<1x64x64xf32>
    %77 = vector.shape_cast %76 : vector<1x64x64xf32> to vector<64x64xf32>
    %cst_66 = arith.constant dense<0.000000e+00> : vector<16x64xf32>
    %78 = tpu.matmul %69, %77, %cst_66 {dimension_numbers = #tpu.dot_dimension_numbers<[1], [0], [0], [1], [0, 0, 1, 1], [], []>} : vector<16x64xf32>, vector<64x64xf32>, vector<16x64xf32> -> vector<16x64xf32>
    %79 = arith.addf %75, %78 : vector<16x64xf32>
    %c2_67 = arith.constant 2 : index
    %c0_68 = arith.constant 0 : index
    %c0_69 = arith.constant 0 : index
    %80 = vector.load %arg8[%c2_67, %c0_68, %c0_69] : memref<3x64x64xf32, #tpu.memory_space<vmem>>, vector<1x64x64xf32>
    %81 = vector.shape_cast %80 : vector<1x64x64xf32> to vector<64x64xf32>
    %cst_70 = arith.constant dense<0.000000e+00> : vector<16x64xf32>
    %82 = tpu.matmul %72, %81, %cst_70 {dimension_numbers = #tpu.dot_dimension_numbers<[1], [0], [0], [1], [0, 0, 1, 1], [], []>} : vector<16x64xf32>, vector<64x64xf32>, vector<16x64xf32> -> vector<16x64xf32>
    %83 = arith.addf %79, %82 : vector<16x64xf32>
    %84 = vector.broadcast %70 : vector<1x64xf32> to vector<16x64xf32>
    %85 = arith.addf %83, %84 : vector<16x64xf32>
    %cst_71 = arith.constant 0.000000e+00 : f32
    %86 = vector.broadcast %cst_71 : f32 to vector<16x64xf32>
    %87 = arith.maximumf %85, %86 : vector<16x64xf32>
    %c0_72 = arith.constant 0 : index
    %c0_73 = arith.constant 0 : index
    %88 = vector.load %arg11[%c0_72, %c0_73] : memref<1x8xf32, #tpu.memory_space<vmem>>, vector<1x8xf32>
    %89 = vector.extract_strided_slice %87 {offsets = [0, 0], sizes = [1, 64], strides = [1, 1]} : vector<16x64xf32> to vector<1x64xf32>
    %c0_74 = arith.constant 0 : index
    %c0_75 = arith.constant 0 : index
    %c0_76 = arith.constant 0 : index
    %90 = vector.load %arg10[%c0_74, %c0_75, %c0_76] : memref<16x64x8xf32, #tpu.memory_space<vmem>>, vector<1x64x8xf32>
    %91 = vector.shape_cast %90 : vector<1x64x8xf32> to vector<64x8xf32>
    %cst_77 = arith.constant dense<0.000000e+00> : vector<1x8xf32>
    %92 = tpu.matmul %89, %91, %cst_77 {dimension_numbers = #tpu.dot_dimension_numbers<[1], [0], [0], [1], [0, 0, 1, 1], [], []>} : vector<1x64xf32>, vector<64x8xf32>, vector<1x8xf32> -> vector<1x8xf32>
    %93 = arith.addf %88, %92 : vector<1x8xf32>
    %94 = vector.extract_strided_slice %87 {offsets = [1, 0], sizes = [1, 64], strides = [1, 1]} : vector<16x64xf32> to vector<1x64xf32>
    %c1_78 = arith.constant 1 : index
    %c0_79 = arith.constant 0 : index
    %c0_80 = arith.constant 0 : index
    %95 = vector.load %arg10[%c1_78, %c0_79, %c0_80] : memref<16x64x8xf32, #tpu.memory_space<vmem>>, vector<1x64x8xf32>
    %96 = vector.shape_cast %95 : vector<1x64x8xf32> to vector<64x8xf32>
    %cst_81 = arith.constant dense<0.000000e+00> : vector<1x8xf32>
    %97 = tpu.matmul %94, %96, %cst_81 {dimension_numbers = #tpu.dot_dimension_numbers<[1], [0], [0], [1], [0, 0, 1, 1], [], []>} : vector<1x64xf32>, vector<64x8xf32>, vector<1x8xf32> -> vector<1x8xf32>
    %98 = arith.addf %93, %97 : vector<1x8xf32>
    %99 = vector.extract_strided_slice %87 {offsets = [2, 0], sizes = [1, 64], strides = [1, 1]} : vector<16x64xf32> to vector<1x64xf32>
    %c2_82 = arith.constant 2 : index
    %c0_83 = arith.constant 0 : index
    %c0_84 = arith.constant 0 : index
    %100 = vector.load %arg10[%c2_82, %c0_83, %c0_84] : memref<16x64x8xf32, #tpu.memory_space<vmem>>, vector<1x64x8xf32>
    %101 = vector.shape_cast %100 : vector<1x64x8xf32> to vector<64x8xf32>
    %cst_85 = arith.constant dense<0.000000e+00> : vector<1x8xf32>
    %102 = tpu.matmul %99, %101, %cst_85 {dimension_numbers = #tpu.dot_dimension_numbers<[1], [0], [0], [1], [0, 0, 1, 1], [], []>} : vector<1x64xf32>, vector<64x8xf32>, vector<1x8xf32> -> vector<1x8xf32>
    %103 = arith.addf %98, %102 : vector<1x8xf32>
    %104 = vector.extract_strided_slice %87 {offsets = [3, 0], sizes = [1, 64], strides = [1, 1]} : vector<16x64xf32> to vector<1x64xf32>
    %c3 = arith.constant 3 : index
    %c0_86 = arith.constant 0 : index
    %c0_87 = arith.constant 0 : index
    %105 = vector.load %arg10[%c3, %c0_86, %c0_87] : memref<16x64x8xf32, #tpu.memory_space<vmem>>, vector<1x64x8xf32>
    %106 = vector.shape_cast %105 : vector<1x64x8xf32> to vector<64x8xf32>
    %cst_88 = arith.constant dense<0.000000e+00> : vector<1x8xf32>
    %107 = tpu.matmul %104, %106, %cst_88 {dimension_numbers = #tpu.dot_dimension_numbers<[1], [0], [0], [1], [0, 0, 1, 1], [], []>} : vector<1x64xf32>, vector<64x8xf32>, vector<1x8xf32> -> vector<1x8xf32>
    %108 = arith.addf %103, %107 : vector<1x8xf32>
    %109 = vector.extract_strided_slice %87 {offsets = [4, 0], sizes = [1, 64], strides = [1, 1]} : vector<16x64xf32> to vector<1x64xf32>
    %c4 = arith.constant 4 : index
    %c0_89 = arith.constant 0 : index
    %c0_90 = arith.constant 0 : index
    %110 = vector.load %arg10[%c4, %c0_89, %c0_90] : memref<16x64x8xf32, #tpu.memory_space<vmem>>, vector<1x64x8xf32>
    %111 = vector.shape_cast %110 : vector<1x64x8xf32> to vector<64x8xf32>
    %cst_91 = arith.constant dense<0.000000e+00> : vector<1x8xf32>
    %112 = tpu.matmul %109, %111, %cst_91 {dimension_numbers = #tpu.dot_dimension_numbers<[1], [0], [0], [1], [0, 0, 1, 1], [], []>} : vector<1x64xf32>, vector<64x8xf32>, vector<1x8xf32> -> vector<1x8xf32>
    %113 = arith.addf %108, %112 : vector<1x8xf32>
    %114 = vector.extract_strided_slice %87 {offsets = [5, 0], sizes = [1, 64], strides = [1, 1]} : vector<16x64xf32> to vector<1x64xf32>
    %c5 = arith.constant 5 : index
    %c0_92 = arith.constant 0 : index
    %c0_93 = arith.constant 0 : index
    %115 = vector.load %arg10[%c5, %c0_92, %c0_93] : memref<16x64x8xf32, #tpu.memory_space<vmem>>, vector<1x64x8xf32>
    %116 = vector.shape_cast %115 : vector<1x64x8xf32> to vector<64x8xf32>
    %cst_94 = arith.constant dense<0.000000e+00> : vector<1x8xf32>
    %117 = tpu.matmul %114, %116, %cst_94 {dimension_numbers = #tpu.dot_dimension_numbers<[1], [0], [0], [1], [0, 0, 1, 1], [], []>} : vector<1x64xf32>, vector<64x8xf32>, vector<1x8xf32> -> vector<1x8xf32>
    %118 = arith.addf %113, %117 : vector<1x8xf32>
    %119 = vector.extract_strided_slice %87 {offsets = [6, 0], sizes = [1, 64], strides = [1, 1]} : vector<16x64xf32> to vector<1x64xf32>
    %c6 = arith.constant 6 : index
    %c0_95 = arith.constant 0 : index
    %c0_96 = arith.constant 0 : index
    %120 = vector.load %arg10[%c6, %c0_95, %c0_96] : memref<16x64x8xf32, #tpu.memory_space<vmem>>, vector<1x64x8xf32>
    %121 = vector.shape_cast %120 : vector<1x64x8xf32> to vector<64x8xf32>
    %cst_97 = arith.constant dense<0.000000e+00> : vector<1x8xf32>
    %122 = tpu.matmul %119, %121, %cst_97 {dimension_numbers = #tpu.dot_dimension_numbers<[1], [0], [0], [1], [0, 0, 1, 1], [], []>} : vector<1x64xf32>, vector<64x8xf32>, vector<1x8xf32> -> vector<1x8xf32>
    %123 = arith.addf %118, %122 : vector<1x8xf32>
    %124 = vector.extract_strided_slice %87 {offsets = [7, 0], sizes = [1, 64], strides = [1, 1]} : vector<16x64xf32> to vector<1x64xf32>
    %c7 = arith.constant 7 : index
    %c0_98 = arith.constant 0 : index
    %c0_99 = arith.constant 0 : index
    %125 = vector.load %arg10[%c7, %c0_98, %c0_99] : memref<16x64x8xf32, #tpu.memory_space<vmem>>, vector<1x64x8xf32>
    %126 = vector.shape_cast %125 : vector<1x64x8xf32> to vector<64x8xf32>
    %cst_100 = arith.constant dense<0.000000e+00> : vector<1x8xf32>
    %127 = tpu.matmul %124, %126, %cst_100 {dimension_numbers = #tpu.dot_dimension_numbers<[1], [0], [0], [1], [0, 0, 1, 1], [], []>} : vector<1x64xf32>, vector<64x8xf32>, vector<1x8xf32> -> vector<1x8xf32>
    %128 = arith.addf %123, %127 : vector<1x8xf32>
    %129 = vector.extract_strided_slice %87 {offsets = [8, 0], sizes = [1, 64], strides = [1, 1]} : vector<16x64xf32> to vector<1x64xf32>
    %c8 = arith.constant 8 : index
    %c0_101 = arith.constant 0 : index
    %c0_102 = arith.constant 0 : index
    %130 = vector.load %arg10[%c8, %c0_101, %c0_102] : memref<16x64x8xf32, #tpu.memory_space<vmem>>, vector<1x64x8xf32>
    %131 = vector.shape_cast %130 : vector<1x64x8xf32> to vector<64x8xf32>
    %cst_103 = arith.constant dense<0.000000e+00> : vector<1x8xf32>
    %132 = tpu.matmul %129, %131, %cst_103 {dimension_numbers = #tpu.dot_dimension_numbers<[1], [0], [0], [1], [0, 0, 1, 1], [], []>} : vector<1x64xf32>, vector<64x8xf32>, vector<1x8xf32> -> vector<1x8xf32>
    %133 = arith.addf %128, %132 : vector<1x8xf32>
    %134 = vector.extract_strided_slice %87 {offsets = [9, 0], sizes = [1, 64], strides = [1, 1]} : vector<16x64xf32> to vector<1x64xf32>
    %c9 = arith.constant 9 : index
    %c0_104 = arith.constant 0 : index
    %c0_105 = arith.constant 0 : index
    %135 = vector.load %arg10[%c9, %c0_104, %c0_105] : memref<16x64x8xf32, #tpu.memory_space<vmem>>, vector<1x64x8xf32>
    %136 = vector.shape_cast %135 : vector<1x64x8xf32> to vector<64x8xf32>
    %cst_106 = arith.constant dense<0.000000e+00> : vector<1x8xf32>
    %137 = tpu.matmul %134, %136, %cst_106 {dimension_numbers = #tpu.dot_dimension_numbers<[1], [0], [0], [1], [0, 0, 1, 1], [], []>} : vector<1x64xf32>, vector<64x8xf32>, vector<1x8xf32> -> vector<1x8xf32>
    %138 = arith.addf %133, %137 : vector<1x8xf32>
    %139 = vector.extract_strided_slice %87 {offsets = [10, 0], sizes = [1, 64], strides = [1, 1]} : vector<16x64xf32> to vector<1x64xf32>
    %c10 = arith.constant 10 : index
    %c0_107 = arith.constant 0 : index
    %c0_108 = arith.constant 0 : index
    %140 = vector.load %arg10[%c10, %c0_107, %c0_108] : memref<16x64x8xf32, #tpu.memory_space<vmem>>, vector<1x64x8xf32>
    %141 = vector.shape_cast %140 : vector<1x64x8xf32> to vector<64x8xf32>
    %cst_109 = arith.constant dense<0.000000e+00> : vector<1x8xf32>
    %142 = tpu.matmul %139, %141, %cst_109 {dimension_numbers = #tpu.dot_dimension_numbers<[1], [0], [0], [1], [0, 0, 1, 1], [], []>} : vector<1x64xf32>, vector<64x8xf32>, vector<1x8xf32> -> vector<1x8xf32>
    %143 = arith.addf %138, %142 : vector<1x8xf32>
    %144 = vector.extract_strided_slice %87 {offsets = [11, 0], sizes = [1, 64], strides = [1, 1]} : vector<16x64xf32> to vector<1x64xf32>
    %c11 = arith.constant 11 : index
    %c0_110 = arith.constant 0 : index
    %c0_111 = arith.constant 0 : index
    %145 = vector.load %arg10[%c11, %c0_110, %c0_111] : memref<16x64x8xf32, #tpu.memory_space<vmem>>, vector<1x64x8xf32>
    %146 = vector.shape_cast %145 : vector<1x64x8xf32> to vector<64x8xf32>
    %cst_112 = arith.constant dense<0.000000e+00> : vector<1x8xf32>
    %147 = tpu.matmul %144, %146, %cst_112 {dimension_numbers = #tpu.dot_dimension_numbers<[1], [0], [0], [1], [0, 0, 1, 1], [], []>} : vector<1x64xf32>, vector<64x8xf32>, vector<1x8xf32> -> vector<1x8xf32>
    %148 = arith.addf %143, %147 : vector<1x8xf32>
    %149 = vector.extract_strided_slice %87 {offsets = [12, 0], sizes = [1, 64], strides = [1, 1]} : vector<16x64xf32> to vector<1x64xf32>
    %c12 = arith.constant 12 : index
    %c0_113 = arith.constant 0 : index
    %c0_114 = arith.constant 0 : index
    %150 = vector.load %arg10[%c12, %c0_113, %c0_114] : memref<16x64x8xf32, #tpu.memory_space<vmem>>, vector<1x64x8xf32>
    %151 = vector.shape_cast %150 : vector<1x64x8xf32> to vector<64x8xf32>
    %cst_115 = arith.constant dense<0.000000e+00> : vector<1x8xf32>
    %152 = tpu.matmul %149, %151, %cst_115 {dimension_numbers = #tpu.dot_dimension_numbers<[1], [0], [0], [1], [0, 0, 1, 1], [], []>} : vector<1x64xf32>, vector<64x8xf32>, vector<1x8xf32> -> vector<1x8xf32>
    %153 = arith.addf %148, %152 : vector<1x8xf32>
    %154 = vector.extract_strided_slice %87 {offsets = [13, 0], sizes = [1, 64], strides = [1, 1]} : vector<16x64xf32> to vector<1x64xf32>
    %c13 = arith.constant 13 : index
    %c0_116 = arith.constant 0 : index
    %c0_117 = arith.constant 0 : index
    %155 = vector.load %arg10[%c13, %c0_116, %c0_117] : memref<16x64x8xf32, #tpu.memory_space<vmem>>, vector<1x64x8xf32>
    %156 = vector.shape_cast %155 : vector<1x64x8xf32> to vector<64x8xf32>
    %cst_118 = arith.constant dense<0.000000e+00> : vector<1x8xf32>
    %157 = tpu.matmul %154, %156, %cst_118 {dimension_numbers = #tpu.dot_dimension_numbers<[1], [0], [0], [1], [0, 0, 1, 1], [], []>} : vector<1x64xf32>, vector<64x8xf32>, vector<1x8xf32> -> vector<1x8xf32>
    %158 = arith.addf %153, %157 : vector<1x8xf32>
    %159 = vector.extract_strided_slice %87 {offsets = [14, 0], sizes = [1, 64], strides = [1, 1]} : vector<16x64xf32> to vector<1x64xf32>
    %c14 = arith.constant 14 : index
    %c0_119 = arith.constant 0 : index
    %c0_120 = arith.constant 0 : index
    %160 = vector.load %arg10[%c14, %c0_119, %c0_120] : memref<16x64x8xf32, #tpu.memory_space<vmem>>, vector<1x64x8xf32>
    %161 = vector.shape_cast %160 : vector<1x64x8xf32> to vector<64x8xf32>
    %cst_121 = arith.constant dense<0.000000e+00> : vector<1x8xf32>
    %162 = tpu.matmul %159, %161, %cst_121 {dimension_numbers = #tpu.dot_dimension_numbers<[1], [0], [0], [1], [0, 0, 1, 1], [], []>} : vector<1x64xf32>, vector<64x8xf32>, vector<1x8xf32> -> vector<1x8xf32>
    %163 = arith.addf %158, %162 : vector<1x8xf32>
    %164 = vector.extract_strided_slice %87 {offsets = [15, 0], sizes = [1, 64], strides = [1, 1]} : vector<16x64xf32> to vector<1x64xf32>
    %c15 = arith.constant 15 : index
    %c0_122 = arith.constant 0 : index
    %c0_123 = arith.constant 0 : index
    %165 = vector.load %arg10[%c15, %c0_122, %c0_123] : memref<16x64x8xf32, #tpu.memory_space<vmem>>, vector<1x64x8xf32>
    %166 = vector.shape_cast %165 : vector<1x64x8xf32> to vector<64x8xf32>
    %cst_124 = arith.constant dense<0.000000e+00> : vector<1x8xf32>
    %167 = tpu.matmul %164, %166, %cst_124 {dimension_numbers = #tpu.dot_dimension_numbers<[1], [0], [0], [1], [0, 0, 1, 1], [], []>} : vector<1x64xf32>, vector<64x8xf32>, vector<1x8xf32> -> vector<1x8xf32>
    %168 = arith.addf %163, %167 : vector<1x8xf32>
    %c0_125 = arith.constant 0 : index
    %c0_126 = arith.constant 0 : index
    %c0_127 = arith.constant 0 : index
    %169 = vector.load %arg12[%c0_125, %c0_126, %c0_127] : memref<1x1x8xf32, #tpu.memory_space<vmem>>, vector<1x1x8xf32>
    %170 = vector.shape_cast %169 : vector<1x1x8xf32> to vector<1x8xf32>
    %171 = vector.shape_cast %168 : vector<1x8xf32> to vector<1x1x8xf32>
    tpu.vector_store %arg12[%c0_125, %c0_126, %c0_127], %171 {strides = array<i32>} : memref<1x1x8xf32, #tpu.memory_space<vmem>>, vector<1x1x8xf32>,
    return
  }
  func.func @transform_0(%arg0: i32) -> (i32, i32, i32) {
    %c0_i32 = arith.constant 0 : i32
    %c0_i32_0 = arith.constant 0 : i32
    %c0_i32_1 = arith.constant 0 : i32
    return %arg0, %c0_i32, %c0_i32_0 : i32, i32, i32
  }
  func.func @transform_1(%arg0: i32) -> (i32, i32, i32) {
    %c0_i32 = arith.constant 0 : i32
    %c0_i32_0 = arith.constant 0 : i32
    %c0_i32_1 = arith.constant 0 : i32
    %c0_i32_2 = arith.constant 0 : i32
    return %c0_i32, %c0_i32_0, %c0_i32_1 : i32, i32, i32
  }
  func.func @transform_2(%arg0: i32) -> (i32, i32) {
    %c0_i32 = arith.constant 0 : i32
    %c0_i32_0 = arith.constant 0 : i32
    %c0_i32_1 = arith.constant 0 : i32
    return %c0_i32, %c0_i32_0 : i32, i32
  }
  func.func @transform_3(%arg0: i32) -> (i32, i32, i32) {
    %c0_i32 = arith.constant 0 : i32
    %c0_i32_0 = arith.constant 0 : i32
    %c0_i32_1 = arith.constant 0 : i32
    %c0_i32_2 = arith.constant 0 : i32
    return %c0_i32, %c0_i32_0, %c0_i32_1 : i32, i32, i32
  }
  func.func @transform_4(%arg0: i32) -> (i32, i32) {
    %c0_i32 = arith.constant 0 : i32
    %c0_i32_0 = arith.constant 0 : i32
    %c0_i32_1 = arith.constant 0 : i32
    return %c0_i32, %c0_i32_0 : i32, i32
  }
  func.func @transform_5(%arg0: i32) -> (i32, i32, i32) {
    %c0_i32 = arith.constant 0 : i32
    %c0_i32_0 = arith.constant 0 : i32
    %c0_i32_1 = arith.constant 0 : i32
    %c0_i32_2 = arith.constant 0 : i32
    return %c0_i32, %c0_i32_0, %c0_i32_1 : i32, i32, i32
  }
  func.func @transform_6(%arg0: i32) -> (i32, i32) {
    %c0_i32 = arith.constant 0 : i32
    %c0_i32_0 = arith.constant 0 : i32
    %c0_i32_1 = arith.constant 0 : i32
    return %c0_i32, %c0_i32_0 : i32, i32
  }
  func.func @transform_7(%arg0: i32) -> (i32, i32, i32) {
    %c0_i32 = arith.constant 0 : i32
    %c0_i32_0 = arith.constant 0 : i32
    %c0_i32_1 = arith.constant 0 : i32
    %c0_i32_2 = arith.constant 0 : i32
    return %c0_i32, %c0_i32_0, %c0_i32_1 : i32, i32, i32
  }
  func.func @transform_8(%arg0: i32) -> (i32, i32) {
    %c0_i32 = arith.constant 0 : i32
    %c0_i32_0 = arith.constant 0 : i32
    %c0_i32_1 = arith.constant 0 : i32
    return %c0_i32, %c0_i32_0 : i32, i32
  }
  func.func @transform_9(%arg0: i32) -> (i32, i32, i32) {
    %c0_i32 = arith.constant 0 : i32
    %c0_i32_0 = arith.constant 0 : i32
    %c0_i32_1 = arith.constant 0 : i32
    %c0_i32_2 = arith.constant 0 : i32
    return %c0_i32, %c0_i32_0, %c0_i32_1 : i32, i32, i32
  }
  func.func @transform_10(%arg0: i32) -> (i32, i32) {
    %c0_i32 = arith.constant 0 : i32
    %c0_i32_0 = arith.constant 0 : i32
    %c0_i32_1 = arith.constant 0 : i32
    return %c0_i32, %c0_i32_0 : i32, i32
  }
  func.func @transform_11(%arg0: i32) -> (i32, i32, i32) {
    %c0_i32 = arith.constant 0 : i32
    %c0_i32_0 = arith.constant 0 : i32
    %c0_i32_1 = arith.constant 0 : i32
    return %arg0, %c0_i32, %c0_i32_0 : i32, i32, i32
  }
}

</mosaic_0001>

<bundles_post_ra>
// kernel: timesnet_forward.1
= control target key start
LH: loop header
LB: loop body
LE: loop exit
PB: predicated region body
PF: predicated region fallthrough
CT: control target
= control target key end

     0   :  { %s5749_s0 = inlined_call_operand.vmem [shape: f32[2,16,4], index: 0, kind: input, shape index: {}]   ;;  %s5750_s1 = inlined_call_operand.vmem [shape: f32[3,4,64], index: 1, kind: input, shape index: {}]   ;;  %s5751_s2 = inlined_call_operand.vmem [shape: f32[1,64], index: 2, kind: input, shape index: {}]   ;;  %s5752_s3 = inlined_call_operand.vmem [shape: f32[3,64,64], index: 3, kind: input, shape index: {}]   ;;  %s5753_s4 = inlined_call_operand.vmem [shape: f32[1,64], index: 4, kind: input, shape index: {}]   ;;  %s5754_s5 = inlined_call_operand.vmem [shape: f32[3,64,64], index: 5, kind: input, shape index: {}]   ;;  %s5755_s6 = inlined_call_operand.vmem [shape: f32[1,64], index: 6, kind: input, shape index: {}]   ;;  %s5756_s7 = inlined_call_operand.vmem [shape: f32[3,64,64], index: 7, kind: input, shape index: {}]   ;;  %s5757_s8 = inlined_call_operand.vmem [shape: f32[1,64], index: 8, kind: input, shape index: {}]   ;;  %s5758_s9 = inlined_call_operand.vmem [shape: f32[16,64,8], index: 9, kind: input, shape index: {}]   ;;  %s5759_s10 = inlined_call_operand.vmem [shape: f32[1,8], index: 10, kind: input, shape index: {}]   ;;  %s5760_s11 = inlined_call_operand.hbm [shape: f32[2,1,8], index: 11, kind: output, shape index: {}]  }
   0x1   :  { %5761 = sst [smem:[#allocation5_spill]] %s5749_s0 }
   0x2   :  { %16 = vsyncpa [#allocation3], 0 }
   0x3   :  { %18 = vsyncpa [#allocation3 + $0x1], 0  ;;  %s4765_s17 = smov 0   ;;  %s4767_s18 = smov 0  }
   0x4   :  { %s4769_s19 = smov 0   ;;  %s4771_s20 = smov 0  }
   0x5 LB: > { %s4786_s21 = sadd.s32 4294967295, %s4700_s20   ;;  %s3533_s22 = sadd.s32 4294967294, %s4700_s20   ;;  %s4700_s20 = sphi %s4771_s20, %s5768_s20   ;;  %s4696_s19 = sphi %s4769_s19, %s5767_s19   ;;  %s4692_s18 = sphi %s4767_s18, %s5766_s18   ;;  %s4688_s17 = sphi %s4765_s17, %s5765_s17  }
   0x6   : > { %s4790_s23 = sadd.s32 1, %s4700_s20   ;;  %s267_s24 = sadd.s32 1, %s4696_s19 }
   0x7   : > { %s264_s25 = ssub.s32 %s4700_s20, %s4790_s23  ;;  %p277_p0 = scmp.ne.s32.totalorder %s4696_s19, %s4692_s18 }
   0x8   : > { %p265_p1 = scmp.eq.s32.totalorder %s264_s25, 0  ;;  %p278_p2 = scmp.eq.s32.totalorder %s4786_s21, 1 }
   0x9   : > { %p283_p3 = scmp.ne.s32.totalorder %s4692_s18, %s4688_s17  ;;  %p284_p4 = scmp.eq.s32.totalorder %s3533_s22, 1 }
   0xa   : > { %s4801_s26 = scalar_select %p265_p1, %s4696_s19, %s267_s24  }
   0xb   : > { %p4803_p5 = por %p278_p2, %p277_p0  ;;  %p4807_p6 = por %p284_p4, %p283_p3 }
   0xc   : > { %p3536_p7 = scmp.ge.s32.totalorder %s4700_s20, 1  ;;  %p340_p8 = scmp.lt.s32.totalorder %s4700_s20, 3 }
   0xe   : > { %p341_p9 = pnand %p3536_p7, %p340_p8 }
   0xf   : > { %p379_p10 = scmp.lt.s32.totalorder (!%p341_p9), %s4786_s21, 1  ;;  %s5764_s0 = sld [smem:[#allocation5_spill]] (!%p341_p9) }
  0x10   : > { %344 = sbr.rel (%p341_p9) target bundleno = 1973 (0x7b5), region = 64  ;;  %s3774_s12 = sshll.u32 (!%p341_p9), %s4786_s21, 4 }
  0x11   : > { %s5714_s22 = scalar_lea.hbm (!%p341_p9), %s5760_s11, %s3774_s12 }
  0x15   : > { %v384_v0 = vlaneseq  ;;  %s380_s29 = scalar_select %p379_p10, %s4786_s21, 1  ;;  %vm404_vm0 = vcmask 130048   ;;  %v4702_v10 = vmov 0.0   ;;  %v3545_v15 = vld [vmem:[%s5750_s1 + $0x4] sm:$0xf]  ;;  %vm577_vm5 = vcmask 1043456  }
  0x16   : > { %vm570_vm6 = vcmask 31744   ;;  %v567_v16 = vld [vmem:[%s5750_s1] sm:$0xf]  ;;  %v3552_v17 = vld [vmem:[%s5750_s1 + $0x8] sm:$0xf]  ;;  %v3568_v37 = vld [vmem:[%s5752_s3 + $0x78] sm:$0xff] }
  0x17   : > { %v385_v1 = vshrl.u32 %v384_v0, 7  ;;  %v388_v2 = vand.u32 127, %v384_v0  ;;  %s3777_s30 = sshll.u32 %s380_s29, 4  ;;  %4072 = vmatprep.subr.msk.mxu1 %vm577_vm5, %v567_v16  ;;  %v3556_v27 = vld [vmem:[%s5751_s2] ss:$0 sm:$0xff]  ;;  %vm1006_vm7 = vcmask 523264  }
  0x18   : > { %s383_s14 = scalar_lea.vmem %s5764_s0, %s3777_s30  ;;  %4073 = vmatpush3.msk.msra.mxu1 %vm577_vm5, %v567_v16  ;;  %v996_v38 = vld [vmem:[%s5752_s3 + $0x38] sm:$0xff]  ;;  %v3567_v39 = vld [vmem:[%s5752_s3 + $0x70] sm:$0xff]  ;;  %v3566_v41 = vld [vmem:[%s5752_s3 + $0x68] sm:$0xff]  ;;  %vm4703_vm8 = vmmov 0   ;;  %s377_s30 = sand.u32 1, %s4692_s18   ;;  %vm3463_vm9 = vcmask 57344  }
  0x19   : > { %v3539_v3 = vadd.s32 4294967295, %v385_v1  ;;  %v386_v4 = vadd.s32 8, %v385_v1  ;;  %v395_v5 = vadd.s32 1, %v385_v1  ;;  %v402_v6 = vld [vmem:[%s383_s14 + $0x8] sm:$0xff]  ;;  %v401_v7 = vld [vmem:[%s383_s14] sm:$0xff]  ;;  %v995_v40 = vld [vmem:[%s5752_s3 + $0x30] sm:$0xff] }
  0x1a   : > { %4053 = vmatprep.subr.mxu0 %v402_v6  ;;  %v994_v42 = vld [vmem:[%s5752_s3 + $0x28] sm:$0xff]  ;;  %v3565_v43 = vld [vmem:[%s5752_s3 + $0x60] sm:$0xff]  ;;  %v3564_v45 = vld [vmem:[%s5752_s3 + $0x58] sm:$0xff]  ;;  %s378_s13 = scalar_lea.vmem [#allocation2], %s377_s30  ;;  %s3466_s24 = scalar_lea.sflag [#allocation3], %s377_s30 }
  0x1b   : > { %vm391_vm1 = vcmp.eq.s32.totalorder %v388_v2, %v3539_v3  ;;  %v3540_v8 = vadd.s32 4294967295, %v386_v4  ;;  %vm397_vm2 = vcmp.eq.s32.totalorder %v388_v2, %v395_v5  ;;  %v396_v9 = vadd.s32 1, %v386_v4  ;;  %4054 = vmatpush3.msra.mxu0 %v402_v6  ;;  %v993_v44 = vld [vmem:[%s5752_s3 + $0x20] sm:$0xff]  ;;  %v992_v46 = vld [vmem:[%s5752_s3 + $0x18] sm:$0xff]  ;;  %v3563_v47 = vld [vmem:[%s5752_s3 + $0x50] sm:$0xff]  ;;  %s3478_s14 = sshll.u32 %s378_s13, 4  ;;  %s3479_s14 = int_to_ptr.vmem [resolvable:$true] %s3478_s14 }
  0x1c   : > { %v4819_v11 = vsel %vm391_vm1, 1.0, %v4702_v10  ;;  %4055 = vmatprep.subr.mxu0 %v401_v7  ;;  %v4827_v13 = vsel %vm397_vm2, 1.0, %v4702_v10  ;;  %v991_v48 = vld [vmem:[%s5752_s3 + $0x10] sm:$0xff]  ;;  %v3562_v49 = vld [vmem:[%s5752_s3 + $0x48] sm:$0xff]  ;;  %v3561_v50 = vld [vmem:[%s5752_s3 + $0x40] sm:$0xff]  ;;  %s4640_s25 = scalar_lea.vmem %s3479_s14, 16 }
  0x1d   : > { %4057 = vmatprep.mubr.msk.f32.mxu0 %vm404_vm0, %v4819_v11  ;;  %vm392_vm3 = vcmp.eq.s32.totalorder %v388_v2, %v3540_v8  ;;  %vm398_vm4 = vcmp.eq.s32.totalorder %v388_v2, %v396_v9  ;;  %4056 = vmatpush3.msra.mxu0 %v401_v7  ;;  %v3580_v51 = vld [vmem:[%s5752_s3 + $0xb8] sm:$0xff]  ;;  %v3579_v52 = vld [vmem:[%s5752_s3 + $0xb0] sm:$0xff]  ;;  %v3578_v53 = vld [vmem:[%s5752_s3 + $0xa8] sm:$0xff]  ;;  %p4641_p11 = scmp.ne.s32.totalorder %s3479_s14, %s4640_s25  ;;  %s4704_s21 = smov [#allocation2]  }
  0x1e   : > { %v4824_v12 = vsel %vm392_vm3, 1.0, %v4702_v10  ;;  %4060 = vmatprep.subr.mxu0 %v402_v6  ;;  %v4834_v14 = vsel %vm398_vm4, 1.0, %v4702_v10  ;;  %v3577_v54 = vld [vmem:[%s5752_s3 + $0xa0] sm:$0xff]  ;;  %v3576_v55 = vld [vmem:[%s5752_s3 + $0x98] sm:$0xff]  ;;  %v3575_v56 = vld [vmem:[%s5752_s3 + $0x90] sm:$0xff]  ;;  %s4644_s29 = sshll.u32 %s4704_s21, 4  ;;  %s4645_s29 = int_to_ptr.vmem [resolvable:$false] %s4644_s29 }
  0x1f   : > { %4058 = vmatmul.mubr.msk.f32.vlgmr.msra.gmra.mxu0 %vm404_vm0, %v4824_v12  ;;  %v990_v57 = vld [vmem:[%s5752_s3 + $0x8] sm:$0xff]  ;;  %v989_v59 = vld [vmem:[%s5752_s3] sm:$0xff]  ;;  %v1429_v1 = vld [vmem:[%s5754_s5 + $0x38] sm:$0xff]  ;;  %p4642_p12 = pnand %p4641_p11, %p4803_p5  ;;  %s4646_s0 = scalar_lea.vmem %s4645_s29, 32 }
  0x20   : > { %4061 = vmatpush3.msra.mxu0 %v402_v6  ;;  %4064 = vmatprep.mubr.msk.f32.mxu0 %vm404_vm0, %v4827_v13  ;;  %v3574_v58 = vld [vmem:[%s5752_s3 + $0x88] sm:$0xff]  ;;  %v3573_v60 = vld [vmem:[%s5752_s3 + $0x80] sm:$0xff]  ;;  %v1428_v2 = vld [vmem:[%s5754_s5 + $0x30] sm:$0xff]  ;;  %p4647_p0 = scmp.lt.s32.totalorder %s3479_s14, %s4645_s29  ;;  %p4648_p1 = scmp.lt.s32.totalorder %s4646_s0, %s4640_s25 }
  0x21   : > { %4062 = vmatprep.subr.mxu0 %v401_v7  ;;  %v1427_v3 = vld [vmem:[%s5754_s5 + $0x28] sm:$0xff]  ;;  %v1426_v4 = vld [vmem:[%s5754_s5 + $0x20] sm:$0xff]  ;;  %v1425_v5 = vld [vmem:[%s5754_s5 + $0x18] sm:$0xff]  ;;  %p4643_p13 = pneg %p4642_p12 }
  0x22   : > { %4063 = vmatpush3.msra.mxu0 %v401_v7  ;;  %p4649_p2 = por %p4648_p1, %p4647_p0 }
  0x23   : > { %4065 = vmatmul.mubr.msk.f32.vlgmr.msra.gmra.mxu0 %vm404_vm0, %v4834_v14  ;;  %4067 = vmatprep.subr.msk.mxu0 %vm577_vm5, %v3545_v15 }
  0x24   : > { %4068 = vmatpush3.msk.msra.mxu0 %vm577_vm5, %v3545_v15  ;;  %4069 = vmatprep.mubr.msk.f32.mxu0 %vm570_vm6, %v401_v7  ;;  %p4650_p3 = pnand %p4649_p2, %p4643_p13 }
  0x25   : > { %4077 = vmatprep.subr.msk.mxu0 %vm577_vm5, %v3552_v17 }
  0x27   : > { %4070 = vmatmul.mubr.msk.f32.vlgmr.msra.gmra.mxu0 %vm570_vm6, %v402_v6  ;;  %v1424_v6 = vld [vmem:[%s5754_s5 + $0x10] sm:$0xff] }
  0x28   : > { %4078 = vmatpush3.msk.msra.mxu0 %vm577_vm5, %v3552_v17  ;;  %v3583_v17 = vld [vmem:[%s5753_s4] ss:$0 sm:$0xff] }
  0xdf   : > { %v4059_v18 = vpop.f32.mrf.mxu0 }
  0xe1   : > { %v477_v19 = vpop.f32.mrf.mxu0 }
  0xe2   : > { %4074 = vmatprep.mubr.msk.f32.mxu1 %vm570_vm6, %v477_v19 }
  0xe3   : > { %v4066_v20 = vpop.f32.mrf.mxu0  ;;  %4075 = vmatmul.mubr.msk.f32.vlgmr.msra.gmra.mxu1 %vm570_vm6, %v4059_v18 }
  0xe4   : > { %4086 = vmatprep.mubr.msk.f32.mxu1 %vm404_vm0, %v4819_v11 }
  0xe5   : > { %v558_v21 = vpop.f32.mrf.mxu0 }
  0xe6   : > { %4079 = vmatprep.mubr.msk.f32.mxu0 %vm570_vm6, %v558_v21 }
  0xe7   : > { %4080 = vmatmul.mubr.msk.f32.vlgmr.msra.gmra.mxu0 %vm570_vm6, %v4066_v20  ;;  %v4071_v22 = vpop.f32.mrf.mxu0 }
  0xe8   : > { %4093 = vmatprep.mubr.msk.f32.mxu0 %vm404_vm0, %v4827_v13 }
  0xe9   : > { %v647_v24 = vpop.f32.mrf.mxu0 }
 0x1a3   : > { %v4076_v23 = vpop.f32.mrf.mxu1 }
 0x1a4   : > { %v737_v26 = vadd.f32 %v4076_v23, %v4071_v22 }
 0x1a5   : > { %v731_v25 = vpop.f32.mrf.mxu1 }
 0x1a6   : > { %v732_v29 = vadd.f32 %v731_v25, %v647_v24 }
 0x1a7   : > { %v4081_v28 = vpop.f32.mrf.mxu0 }
 0x1a8   : > { %v827_v30 = vadd.f32 %v4081_v28, %v737_v26  ;;  %v3594_v28 = vld [vmem:[%s5754_s5 + $0x70] sm:$0xff] }
 0x1a9   : > { %v817_v31 = vpop.f32.mrf.mxu0 }
 0x1aa   : > { %v835_v32 = vadd.f32 %v3556_v27, %v827_v30  ;;  %v826_v33 = vadd.f32 %v817_v31, %v732_v29  ;;  %v3593_v29 = vld [vmem:[%s5754_s5 + $0x68] sm:$0xff]  ;;  %v3592_v30 = vld [vmem:[%s5754_s5 + $0x60] sm:$0xff]  ;;  %v3591_v31 = vld [vmem:[%s5754_s5 + $0x58] sm:$0xff] }
 0x1ac   : > { %v837_v34 = vmax.f32 %v835_v32, 0.0  ;;  %v834_v35 = vadd.f32 %v3556_v27, %v826_v33  ;;  %v3595_v27 = vld [vmem:[%s5754_s5 + $0x78] sm:$0xff]  ;;  %v3590_v32 = vld [vmem:[%s5754_s5 + $0x50] sm:$0xff]  ;;  %v3589_v33 = vld [vmem:[%s5754_s5 + $0x48] sm:$0xff] }
 0x1ae   : > { %v836_v36 = vmax.f32 %v834_v35, 0.0  ;;  %4082 = vmatprep.subr.mxu1 %v837_v34  ;;  %4089 = vmatprep.subr.mxu0 %v837_v34  ;;  %v3607_v35 = vld [vmem:[%s5754_s5 + $0xb8] sm:$0xff] }
 0x1af   : > { %4083 = vmatpush3.msra.mxu1 %v837_v34  ;;  %4090 = vmatpush3.msra.mxu0 %v837_v34 }
 0x1b0   : > { %4084 = vmatprep.subr.mxu1 %v836_v36  ;;  %4091 = vmatprep.subr.mxu0 %v836_v36 }
 0x1b1   : > { %4085 = vmatpush3.msra.mxu1 %v836_v36  ;;  %4092 = vmatpush3.msra.mxu0 %v836_v36 }
 0x1b2   : > { %4087 = vmatmul.mubr.msk.f32.vlgmr.msra.gmra.mxu1 %vm404_vm0, %v4824_v12  ;;  %4094 = vmatmul.mubr.msk.f32.vlgmr.msra.gmra.mxu0 %vm404_vm0, %v4834_v14 }
 0x1b3   : > { %4096 = vmatprep.subr.mxu1 %v3568_v37  ;;  %4112 = vmatprep.mubr.msk.f32.mxu1 %vm1006_vm7, %v836_v36  ;;  %v3606_v36 = vld [vmem:[%s5754_s5 + $0xb0] sm:$0xff] }
 0x1b4   : > { %4097 = vmatpush3.msra.mxu1 %v3568_v37  ;;  %4115 = vmatprep.subr.mxu0 %v996_v38  ;;  %v3605_v37 = vld [vmem:[%s5754_s5 + $0xa8] sm:$0xff] }
 0x1b5   : > { %4098 = vmatprep.subr.mxu1 %v3567_v39  ;;  %4116 = vmatpush3.msra.mxu0 %v996_v38  ;;  %v3604_v38 = vld [vmem:[%s5754_s5 + $0xa0] sm:$0xff] }
 0x1b6   : > { %4099 = vmatpush3.msra.mxu1 %v3567_v39  ;;  %4117 = vmatprep.subr.mxu0 %v995_v40  ;;  %v1423_v39 = vld [vmem:[%s5754_s5 + $0x8] sm:$0xff] }
 0x1b7   : > { %4100 = vmatprep.subr.mxu1 %v3566_v41  ;;  %4118 = vmatpush3.msra.mxu0 %v995_v40  ;;  %v3603_v40 = vld [vmem:[%s5754_s5 + $0x98] sm:$0xff] }
 0x1b8   : > { %4101 = vmatpush3.msra.mxu1 %v3566_v41  ;;  %4119 = vmatprep.subr.mxu0 %v994_v42  ;;  %v1422_v41 = vld [vmem:[%s5754_s5] sm:$0xff] }
 0x1b9   : > { %4102 = vmatprep.subr.mxu1 %v3565_v43  ;;  %4120 = vmatpush3.msra.mxu0 %v994_v42  ;;  %v3602_v42 = vld [vmem:[%s5754_s5 + $0x90] sm:$0xff] }
 0x1ba   : > { %4103 = vmatpush3.msra.mxu1 %v3565_v43  ;;  %4121 = vmatprep.subr.mxu0 %v993_v44  ;;  %v3601_v43 = vld [vmem:[%s5754_s5 + $0x88] sm:$0xff] }
 0x1bb   : > { %4104 = vmatprep.subr.mxu1 %v3564_v45  ;;  %4122 = vmatpush3.msra.mxu0 %v993_v44  ;;  %v3600_v44 = vld [vmem:[%s5754_s5 + $0x80] sm:$0xff] }
 0x1bc   : > { %4105 = vmatpush3.msra.mxu1 %v3564_v45  ;;  %4123 = vmatprep.subr.mxu0 %v992_v46 }
 0x1bd   : > { %4106 = vmatprep.subr.mxu1 %v3563_v47  ;;  %4124 = vmatpush3.msra.mxu0 %v992_v46 }
 0x1be   : > { %4107 = vmatpush3.msra.mxu1 %v3563_v47  ;;  %4125 = vmatprep.subr.mxu0 %v991_v48 }
 0x1bf   : > { %4108 = vmatprep.subr.mxu1 %v3562_v49  ;;  %4126 = vmatpush3.msra.mxu0 %v991_v48 }
 0x1c0   : > { %4109 = vmatpush3.msra.mxu1 %v3562_v49  ;;  %4127 = vmatprep.subr.mxu0 %v990_v57  ;;  %v1861_v49 = vld [vmem:[%s5756_s7 + $0x38] sm:$0xff] }
 0x1c1   : > { %4110 = vmatprep.subr.mxu1 %v3561_v50  ;;  %4128 = vmatpush3.msra.mxu0 %v990_v57 }
 0x1c2   : > { %4111 = vmatpush3.msra.mxu1 %v3561_v50  ;;  %4129 = vmatprep.subr.mxu0 %v989_v59  ;;  %v1860_v50 = vld [vmem:[%s5756_s7 + $0x30] sm:$0xff] }
 0x1c3   : > { %4113 = vmatmul.mubr.msk.f32.vlgmr.msra.gmra.mxu1 %vm1006_vm7, %v837_v34  ;;  %4134 = vmatprep.subr.mxu1 %v3580_v51  ;;  %v3588_v34 = vld [vmem:[%s5754_s5 + $0x40] sm:$0xff] }
 0x1c4   : > { %4135 = vmatpush3.msra.mxu1 %v3580_v51  ;;  %4130 = vmatpush3.msra.mxu0 %v989_v59  ;;  %v1859_v51 = vld [vmem:[%s5756_s7 + $0x28] sm:$0xff]  ;;  %v3610_v59 = vld [vmem:[%s5755_s6] ss:$0 sm:$0xff] }
 0x1c5   : > { %4136 = vmatprep.subr.mxu1 %v3579_v52 }
 0x1c6   : > { %4137 = vmatpush3.msra.mxu1 %v3579_v52  ;;  %v1857_v52 = vld [vmem:[%s5756_s7 + $0x18] sm:$0xff] }
 0x1c7   : > { %4138 = vmatprep.subr.mxu1 %v3578_v53 }
 0x1c8   : > { %4139 = vmatpush3.msra.mxu1 %v3578_v53  ;;  %v1856_v53 = vld [vmem:[%s5756_s7 + $0x10] sm:$0xff] }
 0x1c9   : > { %4140 = vmatprep.subr.mxu1 %v3577_v54 }
 0x1ca   : > { %4141 = vmatpush3.msra.mxu1 %v3577_v54 }
 0x1cb   : > { %4142 = vmatprep.subr.mxu1 %v3576_v55 }
 0x1cc   : > { %4143 = vmatpush3.msra.mxu1 %v3576_v55 }
 0x1cd   : > { %4144 = vmatprep.subr.mxu1 %v3575_v56 }
 0x1ce   : > { %4145 = vmatpush3.msra.mxu1 %v3575_v56 }
 0x1cf   : > { %4146 = vmatprep.subr.mxu1 %v3574_v58 }
 0x1d0   : > { %4147 = vmatpush3.msra.mxu1 %v3574_v58 }
 0x1d1   : > { %4148 = vmatprep.subr.mxu1 %v3573_v60 }
 0x1d2   : > { %4149 = vmatpush3.msra.mxu1 %v3573_v60 }
 0x1d3   : > { %4186 = vmatprep.subr.mxu1 %v1429_v1 }
 0x272   : > { %v4088_v61 = vpop.f32.mrf.mxu1  ;;  %v4095_v62 = vpop.f32.mrf.mxu0 }
 0x274   : > { %v905_v63 = vpop.f32.mrf.mxu1  ;;  %v980_v0 = vpop.f32.mrf.mxu0 }
 0x275   : > { %4131 = vmatprep.mubr.msk.f32.mxu0 %vm1006_vm7, %v905_v63  ;;  %4150 = vmatprep.mubr.msk.f32.mxu1 %vm1006_vm7, %v980_v0 }
 0x276   : > { %4132 = vmatmul.mubr.msk.f32.vlgmr.msra.gmra.mxu0 %vm1006_vm7, %v4088_v61  ;;  %4151 = vmatmul.mubr.msk.f32.vlgmr.msra.gmra.mxu1 %vm1006_vm7, %v4095_v62 }
 0x277   : > { %4157 = vmatprep.mubr.msk.f32.mxu0 %vm404_vm0, %v4819_v11  ;;  %4187 = vmatpush3.msra.mxu1 %v1429_v1 }
 0x278   : > { %4188 = vmatprep.subr.mxu1 %v1428_v2 }
 0x279   : > { %4189 = vmatpush3.msra.mxu1 %v1428_v2 }
 0x27a   : > { %4190 = vmatprep.subr.mxu1 %v1427_v3 }
 0x27b   : > { %4191 = vmatpush3.msra.mxu1 %v1427_v3 }
 0x27c   : > { %4192 = vmatprep.subr.mxu1 %v1426_v4 }
 0x27d   : > { %4193 = vmatpush3.msra.mxu1 %v1426_v4 }
 0x27e   : > { %4194 = vmatprep.subr.mxu1 %v1425_v5 }
 0x27f   : > { %4195 = vmatpush3.msra.mxu1 %v1425_v5  ;;  %v3622_v5 = vld [vmem:[%s5756_s7 + $0x78] sm:$0xff] }
 0x280   : > { %4196 = vmatprep.subr.mxu1 %v1424_v6 }
 0x281   : > { %4197 = vmatpush3.msra.mxu1 %v1424_v6  ;;  %v3621_v6 = vld [vmem:[%s5756_s7 + $0x70] sm:$0xff] }
 0x282   : > { %4198 = vmatprep.subr.mxu1 %v1423_v39 }
 0x283   : > { %v4114_v7 = vpop.f32.mrf.mxu1  ;;  %4199 = vmatpush3.msra.mxu1 %v1423_v39  ;;  %v3642_v39 = vld [vmem:[%s5758_s9 + $0x58] sm:$0xff] }
 0x284   : > { %4200 = vmatprep.subr.mxu1 %v1422_v41 }
 0x285   : > { %v1079_v8 = vpop.f32.mrf.mxu1  ;;  %4201 = vmatpush3.msra.mxu1 %v1422_v41  ;;  %v3641_v41 = vld [vmem:[%s5758_s9 + $0x50] sm:$0xff] }
 0x336   : > { %v4133_v9 = vpop.f32.mrf.mxu0  ;;  %v4152_v15 = vpop.f32.mrf.mxu1 }
 0x337   : > { %v1166_v16 = vadd.f32 %v4133_v9, %v4114_v7  ;;  %v3617_v7 = vld [vmem:[%s5756_s7 + $0x50] sm:$0xff]  ;;  %v3615_v9 = vld [vmem:[%s5756_s7 + $0x40] sm:$0xff] }
 0x338   : > { %v1160_v18 = vpop.f32.mrf.mxu0  ;;  %v1250_v21 = vpop.f32.mrf.mxu1 }
 0x339   : > { %v1260_v19 = vadd.f32 %v4152_v15, %v1166_v16  ;;  %v1161_v20 = vadd.f32 %v1160_v18, %v1079_v8  ;;  %v3616_v8 = vld [vmem:[%s5756_s7 + $0x48] sm:$0xff]  ;;  %v3634_v15 = vld [vmem:[%s5756_s7 + $0xb8] sm:$0xff]  ;;  %v3633_v16 = vld [vmem:[%s5756_s7 + $0xb0] sm:$0xff] }
 0x33a   : > { %v3631_v18 = vld [vmem:[%s5756_s7 + $0xa0] sm:$0xff] }
 0x33b   : > { %v1268_v22 = vadd.f32 %v3583_v17, %v1260_v19  ;;  %v1259_v23 = vadd.f32 %v1250_v21, %v1161_v20  ;;  %v1855_v19 = vld [vmem:[%s5756_s7 + $0x8] sm:$0xff]  ;;  %v3630_v20 = vld [vmem:[%s5756_s7 + $0x98] sm:$0xff]  ;;  %v1854_v21 = vld [vmem:[%s5756_s7] sm:$0xff] }
 0x33d   : > { %v1270_v24 = vmax.f32 %v1268_v22, 0.0  ;;  %v1267_v25 = vadd.f32 %v3583_v17, %v1259_v23  ;;  %v3632_v17 = vld [vmem:[%s5756_s7 + $0xa8] sm:$0xff]  ;;  %v3629_v22 = vld [vmem:[%s5756_s7 + $0x90] sm:$0xff] }
 0x33e   : > { %v3628_v23 = vld [vmem:[%s5756_s7 + $0x88] sm:$0xff] }
 0x33f   : > { %v1269_v26 = vmax.f32 %v1267_v25, 0.0  ;;  %4153 = vmatprep.subr.mxu0 %v1270_v24 }
 0x340   : > { %4154 = vmatpush3.msra.mxu0 %v1270_v24 }
 0x341   : > { %4155 = vmatprep.subr.mxu0 %v1269_v26 }
 0x342   : > { %4156 = vmatpush3.msra.mxu0 %v1269_v26 }
 0x343   : > { %4158 = vmatmul.mubr.msk.f32.vlgmr.msra.gmra.mxu0 %vm404_vm0, %v4824_v12  ;;  %4160 = vmatprep.subr.mxu0 %v1270_v24 }
 0x344   : > { %4161 = vmatpush3.msra.mxu0 %v1270_v24  ;;  %4164 = vmatprep.mubr.msk.f32.mxu0 %vm404_vm0, %v4827_v13 }
 0x345   : > { %4162 = vmatprep.subr.mxu0 %v1269_v26 }
 0x346   : > { %4163 = vmatpush3.msra.mxu0 %v1269_v26 }
 0x347   : > { %4165 = vmatmul.mubr.msk.f32.vlgmr.msra.gmra.mxu0 %vm404_vm0, %v4834_v14  ;;  %4167 = vmatprep.subr.mxu0 %v3595_v27 }
 0x348   : > { %4168 = vmatpush3.msra.mxu0 %v3595_v27  ;;  %4183 = vmatprep.mubr.msk.f32.mxu0 %vm1006_vm7, %v1269_v26  ;;  %v2143_v27 = vld [vmem:[%s5758_s9 + $0x38] sm:$0xff] }
 0x349   : > { %4169 = vmatprep.subr.mxu0 %v3594_v28 }
 0x34a   : > { %4170 = vmatpush3.msra.mxu0 %v3594_v28 }
 0x34b   : > { %4171 = vmatprep.subr.mxu0 %v3593_v29 }
 0x34c   : > { %4172 = vmatpush3.msra.mxu0 %v3593_v29  ;;  %v2142_v29 = vld [vmem:[%s5758_s9 + $0x30] sm:$0xff] }
 0x34d   : > { %4173 = vmatprep.subr.mxu0 %v3592_v30 }
 0x34e   : > { %4174 = vmatpush3.msra.mxu0 %v3592_v30 }
 0x34f   : > { %4175 = vmatprep.subr.mxu0 %v3591_v31 }
 0x350   : > { %4176 = vmatpush3.msra.mxu0 %v3591_v31  ;;  %v3646_v31 = vld [vmem:[%s5758_s9 + $0x78] sm:$0xff] }
 0x351   : > { %4177 = vmatprep.subr.mxu0 %v3590_v32 }
 0x352   : > { %4178 = vmatpush3.msra.mxu0 %v3590_v32  ;;  %v2141_v32 = vld [vmem:[%s5758_s9 + $0x28] sm:$0xff] }
 0x353   : > { %4179 = vmatprep.subr.mxu0 %v3589_v33 }
 0x354   : > { %4180 = vmatpush3.msra.mxu0 %v3589_v33  ;;  %v3645_v33 = vld [vmem:[%s5758_s9 + $0x70] sm:$0xff] }
 0x355   : > { %4181 = vmatprep.subr.mxu0 %v3588_v34 }
 0x356   : > { %4182 = vmatpush3.msra.mxu0 %v3588_v34  ;;  %v2140_v34 = vld [vmem:[%s5758_s9 + $0x20] sm:$0xff] }
 0x357   : > { %4184 = vmatmul.mubr.msk.f32.vlgmr.msra.gmra.mxu0 %vm1006_vm7, %v1270_v24  ;;  %4205 = vmatprep.subr.mxu0 %v3607_v35  ;;  %v3627_v24 = vld [vmem:[%s5756_s7 + $0x80] sm:$0xff] }
 0x358   : > { %4206 = vmatpush3.msra.mxu0 %v3607_v35  ;;  %v3644_v35 = vld [vmem:[%s5758_s9 + $0x68] sm:$0xff] }
 0x359   : > { %4207 = vmatprep.subr.mxu0 %v3606_v36 }
 0x35a   : > { %4208 = vmatpush3.msra.mxu0 %v3606_v36  ;;  %v2139_v36 = vld [vmem:[%s5758_s9 + $0x18] sm:$0xff] }
 0x35b   : > { %4209 = vmatprep.subr.mxu0 %v3605_v37 }
 0x35c   : > { %4210 = vmatpush3.msra.mxu0 %v3605_v37  ;;  %v3643_v37 = vld [vmem:[%s5758_s9 + $0x60] sm:$0xff] }
 0x35d   : > { %4211 = vmatprep.subr.mxu0 %v3604_v38 }
 0x35e   : > { %4212 = vmatpush3.msra.mxu0 %v3604_v38  ;;  %v2138_v38 = vld [vmem:[%s5758_s9 + $0x10] sm:$0xff] }
 0x35f   : > { %4213 = vmatprep.subr.mxu0 %v3603_v40 }
 0x360   : > { %4214 = vmatpush3.msra.mxu0 %v3603_v40  ;;  %v2137_v40 = vld [vmem:[%s5758_s9 + $0x8] sm:$0xff] }
 0x361   : > { %4215 = vmatprep.subr.mxu0 %v3602_v42 }
 0x362   : > { %4216 = vmatpush3.msra.mxu0 %v3602_v42  ;;  %v2136_v42 = vld [vmem:[%s5758_s9] sm:$0xff] }
 0x363   : > { %4217 = vmatprep.subr.mxu0 %v3601_v43 }
 0x364   : > { %4218 = vmatpush3.msra.mxu0 %v3601_v43  ;;  %v3640_v43 = vld [vmem:[%s5758_s9 + $0x48] sm:$0xff] }
 0x365   : > { %4219 = vmatprep.subr.mxu0 %v3600_v44 }
 0x366   : > { %4220 = vmatpush3.msra.mxu0 %v3600_v44  ;;  %v3639_v44 = vld [vmem:[%s5758_s9 + $0x40] sm:$0xff] }
 0x367   : > { %4257 = vmatprep.subr.mxu0 %v1861_v49 }
 0x403   : > { %v4159_v45 = vpop.f32.mrf.mxu0 }
 0x405   : > { %v1338_v46 = vpop.f32.mrf.mxu0 }
 0x406   : > { %4202 = vmatprep.mubr.msk.f32.mxu1 %vm1006_vm7, %v1338_v46 }
 0x407   : > { %v4166_v47 = vpop.f32.mrf.mxu0  ;;  %4203 = vmatmul.mubr.msk.f32.vlgmr.msra.gmra.mxu1 %vm1006_vm7, %v4159_v45 }
 0x408   : > { %4228 = vmatprep.mubr.msk.f32.mxu1 %vm404_vm0, %v4819_v11  ;;  %v1858_v11 = vld [vmem:[%s5756_s7 + $0x20] sm:$0xff] }
 0x409   : > { %v1413_v48 = vpop.f32.mrf.mxu0 }
 0x40a   : > { %4221 = vmatprep.mubr.msk.f32.mxu0 %vm1006_vm7, %v1413_v48 }
 0x40b   : > { %4222 = vmatmul.mubr.msk.f32.vlgmr.msra.gmra.mxu0 %vm1006_vm7, %v4166_v47 }
 0x40c   : > { %4258 = vmatpush3.msra.mxu0 %v1861_v49 }
 0x40d   : > { %4259 = vmatprep.subr.mxu0 %v1860_v50 }
 0x40e   : > { %4260 = vmatpush3.msra.mxu0 %v1860_v50  ;;  %v3637_v50 = vld [vmem:[%s5757_s8] ss:$0 sm:$0xff] }
 0x40f   : > { %4261 = vmatprep.subr.mxu0 %v1859_v51 }
 0x410   : > { %4262 = vmatpush3.msra.mxu0 %v1859_v51 }
 0x411   : > { %4263 = vmatprep.subr.mxu0 %v1858_v11 }
 0x412   : > { %4264 = vmatpush3.msra.mxu0 %v1858_v11 }
 0x413   : > { %4265 = vmatprep.subr.mxu0 %v1857_v52 }
 0x414   : > { %4266 = vmatpush3.msra.mxu0 %v1857_v52 }
 0x415   : > { %4267 = vmatprep.subr.mxu0 %v1856_v53 }
 0x416   : > { %4268 = vmatpush3.msra.mxu0 %v1856_v53 }
 0x417   : > { %v4185_v54 = vpop.f32.mrf.mxu0  ;;  %4269 = vmatprep.subr.mxu0 %v1855_v19 }
 0x418   : > { %4270 = vmatpush3.msra.mxu0 %v1855_v19  ;;  %v3681_v19 = vld [vmem:[%s5758_s9 + $0x170] sm:$0xff] }
 0x419   : > { %v1511_v56 = vpop.f32.mrf.mxu0  ;;  %4271 = vmatprep.subr.mxu0 %v1854_v21 }
 0x41a   : > { %4272 = vmatpush3.msra.mxu0 %v1854_v21  ;;  %v3680_v21 = vld [vmem:[%s5758_s9 + $0x168] sm:$0xff] }
 0x41b   : > { %4295 = vmatprep.subr.mxu0 %v4702_v10 }
 0x4c7   : > { %v4204_v55 = vpop.f32.mrf.mxu1 }
 0x4c8   : > { %v1598_v58 = vadd.f32 %v4204_v55, %v4185_v54 }
 0x4c9   : > { %v1592_v57 = vpop.f32.mrf.mxu1 }
 0x4ca   : > { %v1593_v61 = vadd.f32 %v1592_v57, %v1511_v56 }
 0x4cb   : > { %v4223_v60 = vpop.f32.mrf.mxu0 }
 0x4cc   : > { %v1692_v62 = vadd.f32 %v4223_v60, %v1598_v58  ;;  %v3655_v58 = vld [vmem:[%s5758_s9 + $0xb8] sm:$0xff]  ;;  %v3654_v60 = vld [vmem:[%s5758_s9 + $0xb0] sm:$0xff] }
 0x4cd   : > { %v1682_v63 = vpop.f32.mrf.mxu0 }
 0x4ce   : > { %v1700_v0 = vadd.f32 %v3610_v59, %v1692_v62  ;;  %v1691_v1 = vadd.f32 %v1682_v63, %v1593_v61  ;;  %v3664_v61 = vld [vmem:[%s5758_s9 + $0xf8] sm:$0xff]  ;;  %v3653_v62 = vld [vmem:[%s5758_s9 + $0xa8] sm:$0xff]  ;;  %v3663_v63 = vld [vmem:[%s5758_s9 + $0xf0] sm:$0xff] }
 0x4d0   : > { %v1702_v2 = vmax.f32 %v1700_v0, 0.0  ;;  %v1699_v3 = vadd.f32 %v3610_v59, %v1691_v1  ;;  %v3652_v0 = vld [vmem:[%s5758_s9 + $0xa0] sm:$0xff]  ;;  %v3662_v1 = vld [vmem:[%s5758_s9 + $0xe8] sm:$0xff] }
 0x4d2   : > { %v1701_v4 = vmax.f32 %v1699_v3, 0.0  ;;  %4224 = vmatprep.subr.mxu1 %v1702_v2  ;;  %v3661_v3 = vld [vmem:[%s5758_s9 + $0xe0] sm:$0xff] }
 0x4d3   : > { %4225 = vmatpush3.msra.mxu1 %v1702_v2 }
 0x4d4   : > { %4226 = vmatprep.subr.mxu1 %v1701_v4 }
 0x4d5   : > { %4227 = vmatpush3.msra.mxu1 %v1701_v4 }
 0x4d6   : > { %4229 = vmatmul.mubr.msk.f32.vlgmr.msra.gmra.mxu1 %vm404_vm0, %v4824_v12  ;;  %4231 = vmatprep.subr.mxu1 %v1702_v2  ;;  %v3620_v12 = vld [vmem:[%s5756_s7 + $0x68] sm:$0xff] }
 0x4d7   : > { %4232 = vmatpush3.msra.mxu1 %v1702_v2  ;;  %4235 = vmatprep.mubr.msk.f32.mxu1 %vm404_vm0, %v4827_v13  ;;  %v3619_v13 = vld [vmem:[%s5756_s7 + $0x60] sm:$0xff] }
 0x4d8   : > { %4233 = vmatprep.subr.mxu1 %v1701_v4 }
 0x4d9   : > { %4234 = vmatpush3.msra.mxu1 %v1701_v4 }
 0x4da   : > { %4236 = vmatmul.mubr.msk.f32.vlgmr.msra.gmra.mxu1 %vm404_vm0, %v4834_v14  ;;  %4238 = vmatprep.subr.mxu1 %v3622_v5  ;;  %v3618_v14 = vld [vmem:[%s5756_s7 + $0x58] sm:$0xff] }
 0x4db   : > { %4239 = vmatpush3.msra.mxu1 %v3622_v5  ;;  %4254 = vmatprep.mubr.msk.f32.mxu1 %vm1006_vm7, %v1701_v4  ;;  %v3650_v4 = vld [vmem:[%s5758_s9 + $0x90] sm:$0xff]  ;;  %v3660_v5 = vld [vmem:[%s5758_s9 + $0xd8] sm:$0xff] }
 0x4dc   : > { %4240 = vmatprep.subr.mxu1 %v3621_v6 }
 0x4dd   : > { %4241 = vmatpush3.msra.mxu1 %v3621_v6  ;;  %v3649_v6 = vld [vmem:[%s5758_s9 + $0x88] sm:$0xff] }
 0x4de   : > { %4242 = vmatprep.subr.mxu1 %v3620_v12 }
 0x4df   : > { %4243 = vmatpush3.msra.mxu1 %v3620_v12  ;;  %v3659_v12 = vld [vmem:[%s5758_s9 + $0xd0] sm:$0xff] }
 0x4e0   : > { %4244 = vmatprep.subr.mxu1 %v3619_v13 }
 0x4e1   : > { %4245 = vmatpush3.msra.mxu1 %v3619_v13  ;;  %v3648_v13 = vld [vmem:[%s5758_s9 + $0x80] sm:$0xff] }
 0x4e2   : > { %4246 = vmatprep.subr.mxu1 %v3618_v14 }
 0x4e3   : > { %4247 = vmatpush3.msra.mxu1 %v3618_v14  ;;  %v3658_v14 = vld [vmem:[%s5758_s9 + $0xc8] sm:$0xff] }
 0x4e4   : > { %4248 = vmatprep.subr.mxu1 %v3617_v7 }
 0x4e5   : > { %4249 = vmatpush3.msra.mxu1 %v3617_v7 }
 0x4e6   : > { %4250 = vmatprep.subr.mxu1 %v3616_v8 }
 0x4e7   : > { %4251 = vmatpush3.msra.mxu1 %v3616_v8  ;;  %v3657_v8 = vld [vmem:[%s5758_s9 + $0xc0] sm:$0xff] }
 0x4e8   : > { %4252 = vmatprep.subr.mxu1 %v3615_v9 }
 0x4e9   : > { %4253 = vmatpush3.msra.mxu1 %v3615_v9  ;;  %v3673_v9 = vld [vmem:[%s5758_s9 + $0x138] sm:$0xff] }
 0x4ea   : > { %4255 = vmatmul.mubr.msk.f32.vlgmr.msra.gmra.mxu1 %vm1006_vm7, %v1702_v2  ;;  %4276 = vmatprep.subr.mxu1 %v3634_v15  ;;  %v3651_v2 = vld [vmem:[%s5758_s9 + $0x98] sm:$0xff] }
 0x4eb   : > { %4277 = vmatpush3.msra.mxu1 %v3634_v15 }
 0x4ec   : > { %4278 = vmatprep.subr.mxu1 %v3633_v16 }
 0x4ed   : > { %4279 = vmatpush3.msra.mxu1 %v3633_v16  ;;  %v3672_v16 = vld [vmem:[%s5758_s9 + $0x130] sm:$0xff] }
 0x4ee   : > { %4280 = vmatprep.subr.mxu1 %v3632_v17 }
 0x4ef   : > { %4281 = vmatpush3.msra.mxu1 %v3632_v17  ;;  %v3682_v17 = vld [vmem:[%s5758_s9 + $0x178] sm:$0xff] }
 0x4f0   : > { %4282 = vmatprep.subr.mxu1 %v3631_v18 }
 0x4f1   : > { %4283 = vmatpush3.msra.mxu1 %v3631_v18  ;;  %v3671_v18 = vld [vmem:[%s5758_s9 + $0x128] sm:$0xff] }
 0x4f2   : > { %4284 = vmatprep.subr.mxu1 %v3630_v20 }
 0x4f3   : > { %4285 = vmatpush3.msra.mxu1 %v3630_v20  ;;  %v3670_v20 = vld [vmem:[%s5758_s9 + $0x120] sm:$0xff] }
 0x4f4   : > { %4286 = vmatprep.subr.mxu1 %v3629_v22 }
 0x4f5   : > { %4287 = vmatpush3.msra.mxu1 %v3629_v22  ;;  %v3669_v22 = vld [vmem:[%s5758_s9 + $0x118] sm:$0xff] }
 0x4f6   : > { %4288 = vmatprep.subr.mxu1 %v3628_v23 }
 0x4f7   : > { %4289 = vmatpush3.msra.mxu1 %v3628_v23  ;;  %v3679_v23 = vld [vmem:[%s5758_s9 + $0x160] sm:$0xff] }
 0x4f8   : > { %4290 = vmatprep.subr.mxu1 %v3627_v24 }
 0x4f9   : > { %4291 = vmatpush3.msra.mxu1 %v3627_v24  ;;  %v3668_v24 = vld [vmem:[%s5758_s9 + $0x110] sm:$0xff] }
 0x4fa   : > { %4314 = vmatprep.subr.mxu1 %v4702_v10 }
 0x596   : > { %v4230_v25 = vpop.f32.mrf.mxu1 }
 0x598   : > { %v1770_v26 = vpop.f32.mrf.mxu1 }
 0x599   : > { %4273 = vmatprep.mubr.msk.f32.mxu0 %vm1006_vm7, %v1770_v26  ;;  %v3667_v26 = vld [vmem:[%s5758_s9 + $0x108] sm:$0xff] }
 0x59a   : > { %v4237_v28 = vpop.f32.mrf.mxu1  ;;  %4274 = vmatmul.mubr.msk.f32.vlgmr.msra.gmra.mxu0 %vm1006_vm7, %v4230_v25  ;;  %v3678_v25 = vld [vmem:[%s5758_s9 + $0x158] sm:$0xff] }
 0x59b   : > { %4296 = vmatpush3.msra.mxu0 %v2143_v27  ;;  %4311 = vmatprep.mubr.msk.f32.mxu0 %vm4703_vm8, %v4702_v10  ;;  %v3677_v27 = vld [vmem:[%s5758_s9 + $0x150] sm:$0xff] }
 0x59c   : > { %v1845_v30 = vpop.f32.mrf.mxu1  ;;  %4297 = vmatprep.subr.mxu0 %v4702_v10 }
 0x59d   : > { %4292 = vmatprep.mubr.msk.f32.mxu1 %vm1006_vm7, %v1845_v30  ;;  %4298 = vmatpush3.msra.mxu0 %v2142_v29  ;;  %v3676_v29 = vld [vmem:[%s5758_s9 + $0x148] sm:$0xff] }
 0x59e   : > { %4293 = vmatmul.mubr.msk.f32.vlgmr.msra.gmra.mxu1 %vm1006_vm7, %v4237_v28  ;;  %4299 = vmatprep.subr.mxu0 %v4702_v10  ;;  %v3666_v28 = vld [vmem:[%s5758_s9 + $0x100] sm:$0xff] }
 0x59f   : > { %4315 = vmatpush3.msra.mxu1 %v3646_v31  ;;  %4300 = vmatpush3.msra.mxu0 %v2141_v32  ;;  %v3675_v31 = vld [vmem:[%s5758_s9 + $0x140] sm:$0xff]  ;;  %v3691_v32 = vld [vmem:[%s5758_s9 + $0x1b8] sm:$0xff] }
 0x5a0   : > { %4316 = vmatprep.subr.mxu1 %v4702_v10  ;;  %4301 = vmatprep.subr.mxu0 %v4702_v10 }
 0x5a1   : > { %4317 = vmatpush3.msra.mxu1 %v3645_v33  ;;  %4302 = vmatpush3.msra.mxu0 %v2140_v34  ;;  %v3690_v34 = vld [vmem:[%s5758_s9 + $0x1b0] sm:$0xff] }
 0x5a2   : > { %4318 = vmatprep.subr.mxu1 %v4702_v10  ;;  %4303 = vmatprep.subr.mxu0 %v4702_v10 }
 0x5a3   : > { %4319 = vmatpush3.msra.mxu1 %v3644_v35  ;;  %4304 = vmatpush3.msra.mxu0 %v2139_v36  ;;  %v3700_v35 = vld [vmem:[%s5758_s9 + $0x1f8] sm:$0xff]  ;;  %v3689_v36 = vld [vmem:[%s5758_s9 + $0x1a8] sm:$0xff] }
 0x5a4   : > { %4320 = vmatprep.subr.mxu1 %v4702_v10  ;;  %4305 = vmatprep.subr.mxu0 %v4702_v10 }
 0x5a5   : > { %4321 = vmatpush3.msra.mxu1 %v3643_v37  ;;  %4306 = vmatpush3.msra.mxu0 %v2138_v38  ;;  %v3699_v37 = vld [vmem:[%s5758_s9 + $0x1f0] sm:$0xff]  ;;  %v3688_v38 = vld [vmem:[%s5758_s9 + $0x1a0] sm:$0xff] }
 0x5a6   : > { %4322 = vmatprep.subr.mxu1 %v4702_v10  ;;  %4307 = vmatprep.subr.mxu0 %v4702_v10 }
 0x5a7   : > { %4323 = vmatpush3.msra.mxu1 %v3642_v39  ;;  %4308 = vmatpush3.msra.mxu0 %v2137_v40  ;;  %v3698_v39 = vld [vmem:[%s5758_s9 + $0x1e8] sm:$0xff]  ;;  %v3687_v40 = vld [vmem:[%s5758_s9 + $0x198] sm:$0xff] }
 0x5a8   : > { %4324 = vmatprep.subr.mxu1 %v4702_v10  ;;  %4309 = vmatprep.subr.mxu0 %v4702_v10 }
 0x5a9   : > { %4325 = vmatpush3.msra.mxu1 %v3641_v41  ;;  %4310 = vmatpush3.msra.mxu0 %v2136_v42  ;;  %v3697_v41 = vld [vmem:[%s5758_s9 + $0x1e0] sm:$0xff]  ;;  %v3686_v42 = vld [vmem:[%s5758_s9 + $0x190] sm:$0xff] }
 0x5aa   : > { %4326 = vmatprep.subr.mxu1 %v4702_v10  ;;  %4333 = vmatprep.subr.mxu0 %v4702_v10  ;;  %v4256_v45 = vpop.f32.mrf.mxu1 }
 0x5ab   : > { %4327 = vmatpush3.msra.mxu1 %v3640_v43  ;;  %4330 = vmatprep.mubr.msk.f32.mxu1 %vm4703_vm8, %v4702_v10  ;;  %v3696_v43 = vld [vmem:[%s5758_s9 + $0x1d8] sm:$0xff] }
 0x5ac   : > { %4328 = vmatprep.subr.mxu1 %v4702_v10  ;;  %v1943_v47 = vpop.f32.mrf.mxu1 }
 0x5ad   : > { %4329 = vmatpush3.msra.mxu1 %v3639_v44  ;;  %v3685_v44 = vld [vmem:[%s5758_s9 + $0x188] sm:$0xff] }
 0x5ae   : > { %4352 = vmatprep.subr.mxu1 %v4702_v10 }
 0x65a   : > { %v4275_v46 = vpop.f32.mrf.mxu0 }
 0x65b   : > { %v2030_v49 = vadd.f32 %v4275_v46, %v4256_v45  ;;  %v3695_v45 = vld [vmem:[%s5758_s9 + $0x1d0] sm:$0xff]  ;;  %v3684_v46 = vld [vmem:[%s5758_s9 + $0x180] sm:$0xff] }
 0x65c   : > { %v2024_v48 = vpop.f32.mrf.mxu0 }
 0x65d   : > { %v2025_v11 = vadd.f32 %v2024_v48, %v1943_v47  ;;  %v3694_v47 = vld [vmem:[%s5758_s9 + $0x1c8] sm:$0xff] }
 0x65e   : > { %v4294_v51 = vpop.f32.mrf.mxu1 }
 0x65f   : > { %v2124_v52 = vadd.f32 %v4294_v51, %v2030_v49  ;;  %v3693_v49 = vld [vmem:[%s5758_s9 + $0x1c0] sm:$0xff] }
 0x660   : > { %v2114_v53 = vpop.f32.mrf.mxu1 }
 0x661   : > { %v5193_v54 = vadd.f32 %v3637_v50, %v2124_v52  ;;  %v2123_v55 = vadd.f32 %v2114_v53, %v2025_v11  ;;  %v3708_v11 = vld [vmem:[%s5758_s9 + $0x230] sm:$0xff]  ;;  %v3718_v52 = vld [vmem:[%s5758_s9 + $0x278] sm:$0xff]  ;;  %v3707_v53 = vld [vmem:[%s5758_s9 + $0x228] sm:$0xff] }
 0x663   : > { %v2131_v56 = vadd.f32 %v3637_v50, %v2123_v55  ;;  %v3709_v50 = vld [vmem:[%s5758_s9 + $0x238] sm:$0xff]  ;;  %v3717_v55 = vld [vmem:[%s5758_s9 + $0x270] sm:$0xff] }
 0x665   : > { %v5195_v57 = vmax.f32 %v2131_v56, 0.0  ;;  %v3706_v56 = vld [vmem:[%s5758_s9 + $0x220] sm:$0xff] }
 0x667   : > { %4312 = vmatmul.mubr.msk.f32.vlgmr.msra.gmra.mxu0 %vm1006_vm7, %v5195_v57  ;;  %v2227_v59 = vrot.slane %v5195_v57, 1  ;;  %v2310_v7 = vrot.slane %v5195_v57, 2  ;;  %v2393_v15 = vrot.slane %v5195_v57, 3  ;;  %v2476_v30 = vrot.slane %v5195_v57, 4 }
 0x668   : > { %4334 = vmatpush3.msra.mxu0 %v3655_v58  ;;  %4349 = vmatprep.mubr.msk.f32.mxu0 %vm4703_vm8, %v4702_v10  ;;  %v2559_v33 = vrot.slane %v5195_v57, 5  ;;  %v2642_v48 = vrot.slane %v5195_v57, 6  ;;  %v2725_v51 = vrot.slane %v5195_v57, 7  ;;  %v3716_v57 = vld [vmem:[%s5758_s9 + $0x268] sm:$0xff]  ;;  %v3705_v58 = vld [vmem:[%s5758_s9 + $0x218] sm:$0xff] }
 0x669   : > { %4335 = vmatprep.subr.mxu0 %v4702_v10  ;;  %4331 = vmatmul.mubr.msk.f32.vlgmr.msra.gmra.mxu1 %vm1006_vm7, %v2227_v59  ;;  %v3715_v59 = vld [vmem:[%s5758_s9 + $0x260] sm:$0xff] }
 0x66a   : > { %4336 = vmatpush3.msra.mxu0 %v3654_v60  ;;  %4353 = vmatpush3.msra.mxu1 %v3664_v61  ;;  %v3704_v60 = vld [vmem:[%s5758_s9 + $0x210] sm:$0xff]  ;;  %v3714_v61 = vld [vmem:[%s5758_s9 + $0x258] sm:$0xff] }
 0x66b   : > { %4337 = vmatprep.subr.mxu0 %v4702_v10  ;;  %4354 = vmatprep.subr.mxu1 %v4702_v10 }
 0x66c   : > { %4338 = vmatpush3.msra.mxu0 %v3653_v62  ;;  %4355 = vmatpush3.msra.mxu1 %v3663_v63  ;;  %v3703_v62 = vld [vmem:[%s5758_s9 + $0x208] sm:$0xff]  ;;  %v3713_v63 = vld [vmem:[%s5758_s9 + $0x250] sm:$0xff] }
 0x66d   : > { %4339 = vmatprep.subr.mxu0 %v4702_v10  ;;  %4356 = vmatprep.subr.mxu1 %v4702_v10 }
 0x66e   : > { %4340 = vmatpush3.msra.mxu0 %v3652_v0  ;;  %4357 = vmatpush3.msra.mxu1 %v3662_v1  ;;  %v3702_v0 = vld [vmem:[%s5758_s9 + $0x200] sm:$0xff]  ;;  %v3712_v1 = vld [vmem:[%s5758_s9 + $0x248] sm:$0xff] }
 0x66f   : > { %4341 = vmatprep.subr.mxu0 %v4702_v10  ;;  %4358 = vmatprep.subr.mxu1 %v4702_v10 }
 0x670   : > { %4342 = vmatpush3.msra.mxu0 %v3651_v2  ;;  %4359 = vmatpush3.msra.mxu1 %v3661_v3  ;;  %v5474_v2 = vmax.f32 %v5193_v54, 0.0  ;;  %v3711_v3 = vld [vmem:[%s5758_s9 + $0x240] sm:$0xff] }
 0x671   : > { %4343 = vmatprep.subr.mxu0 %v4702_v10  ;;  %4360 = vmatprep.subr.mxu1 %v4702_v10 }
 0x672   : > { %4344 = vmatpush3.msra.mxu0 %v3650_v4  ;;  %4361 = vmatpush3.msra.mxu1 %v3660_v5  ;;  %v3727_v4 = vld [vmem:[%s5758_s9 + $0x2b8] sm:$0xff]  ;;  %v2891_v54 = vrot.slane %v5474_v2, 1  ;;  %v3726_v5 = vld [vmem:[%s5758_s9 + $0x2b0] sm:$0xff] }
 0x673   : > { %4345 = vmatprep.subr.mxu0 %v4702_v10  ;;  %4362 = vmatprep.subr.mxu1 %v4702_v10 }
 0x674   : > { %4346 = vmatpush3.msra.mxu0 %v3649_v6  ;;  %4363 = vmatpush3.msra.mxu1 %v3659_v12  ;;  %v3736_v6 = vld [vmem:[%s5758_s9 + $0x2f8] sm:$0xff]  ;;  %v3725_v12 = vld [vmem:[%s5758_s9 + $0x2a8] sm:$0xff] }
 0x675   : > { %4347 = vmatprep.subr.mxu0 %v4702_v10  ;;  %4364 = vmatprep.subr.mxu1 %v4702_v10 }
 0x676   : > { %4348 = vmatpush3.msra.mxu0 %v3648_v13  ;;  %4365 = vmatpush3.msra.mxu1 %v3658_v14  ;;  %v3735_v13 = vld [vmem:[%s5758_s9 + $0x2f0] sm:$0xff]  ;;  %v3724_v14 = vld [vmem:[%s5758_s9 + $0x2a0] sm:$0xff] }
 0x677   : > { %4350 = vmatmul.mubr.msk.f32.vlgmr.msra.gmra.mxu0 %vm1006_vm7, %v2310_v7  ;;  %4366 = vmatprep.subr.mxu1 %v4702_v10  ;;  %v3734_v7 = vld [vmem:[%s5758_s9 + $0x2e8] sm:$0xff] }
 0x678   : > { %4371 = vmatprep.subr.mxu0 %v4702_v10  ;;  %4367 = vmatpush3.msra.mxu1 %v3657_v8  ;;  %v3723_v8 = vld [vmem:[%s5758_s9 + $0x298] sm:$0xff] }
 0x679   : > { %4368 = vmatprep.mubr.msk.f32.mxu1 %vm4703_vm8, %v4702_v10  ;;  %4372 = vmatpush3.msra.mxu0 %v3673_v9  ;;  %v3733_v9 = vld [vmem:[%s5758_s9 + $0x2e0] sm:$0xff] }
 0x67a   : > { %4369 = vmatmul.mubr.msk.f32.vlgmr.msra.gmra.mxu1 %vm1006_vm7, %v2393_v15  ;;  %4373 = vmatprep.subr.mxu0 %v4702_v10  ;;  %v3722_v15 = vld [vmem:[%s5758_s9 + $0x290] sm:$0xff] }
 0x67b   : > { %4390 = vmatprep.subr.mxu1 %v4702_v10  ;;  %4374 = vmatpush3.msra.mxu0 %v3672_v16  ;;  %v3732_v16 = vld [vmem:[%s5758_s9 + $0x2d8] sm:$0xff] }
 0x67c   : > { %4391 = vmatpush3.msra.mxu1 %v3682_v17  ;;  %4375 = vmatprep.subr.mxu0 %v4702_v10  ;;  %v3721_v17 = vld [vmem:[%s5758_s9 + $0x288] sm:$0xff] }
 0x67d   : > { %4392 = vmatprep.subr.mxu1 %v4702_v10  ;;  %4376 = vmatpush3.msra.mxu0 %v3671_v18  ;;  %v3731_v18 = vld [vmem:[%s5758_s9 + $0x2d0] sm:$0xff] }
 0x67e   : > { %4393 = vmatpush3.msra.mxu1 %v3681_v19  ;;  %4377 = vmatprep.subr.mxu0 %v4702_v10  ;;  %v3720_v19 = vld [vmem:[%s5758_s9 + $0x280] sm:$0xff] }
 0x67f   : > { %4394 = vmatprep.subr.mxu1 %v4702_v10  ;;  %4378 = vmatpush3.msra.mxu0 %v3670_v20  ;;  %v3730_v20 = vld [vmem:[%s5758_s9 + $0x2c8] sm:$0xff] }
 0x680   : > { %4395 = vmatpush3.msra.mxu1 %v3680_v21  ;;  %4379 = vmatprep.subr.mxu0 %v4702_v10  ;;  %v2974_v21 = vrot.slane %v5474_v2, 2 }
 0x681   : > { %4396 = vmatprep.subr.mxu1 %v4702_v10  ;;  %4380 = vmatpush3.msra.mxu0 %v3669_v22  ;;  %v3729_v22 = vld [vmem:[%s5758_s9 + $0x2c0] sm:$0xff] }
 0x682   : > { %4397 = vmatpush3.msra.mxu1 %v3679_v23  ;;  %4381 = vmatprep.subr.mxu0 %v4702_v10  ;;  %v3745_v23 = vld [vmem:[%s5758_s9 + $0x338] sm:$0xff] }
 0x683   : > { %4398 = vmatprep.subr.mxu1 %v4702_v10  ;;  %4382 = vmatpush3.msra.mxu0 %v3668_v24  ;;  %v3057_v24 = vrot.slane %v5474_v2, 3 }
 0x684   : > { %4399 = vmatpush3.msra.mxu1 %v3678_v25  ;;  %4383 = vmatprep.subr.mxu0 %v4702_v10  ;;  %v3744_v25 = vld [vmem:[%s5758_s9 + $0x330] sm:$0xff] }
 0x685   : > { %4400 = vmatprep.subr.mxu1 %v4702_v10  ;;  %4384 = vmatpush3.msra.mxu0 %v3667_v26  ;;  %v3754_v26 = vld [vmem:[%s5758_s9 + $0x378] sm:$0xff] }
 0x686   : > { %4401 = vmatpush3.msra.mxu1 %v3677_v27  ;;  %4385 = vmatprep.subr.mxu0 %v4702_v10  ;;  %v3743_v27 = vld [vmem:[%s5758_s9 + $0x328] sm:$0xff] }
 0x687   : > { %4402 = vmatprep.subr.mxu1 %v4702_v10  ;;  %4386 = vmatpush3.msra.mxu0 %v3666_v28  ;;  %v3753_v28 = vld [vmem:[%s5758_s9 + $0x370] sm:$0xff] }
 0x688   : > { %4387 = vmatprep.mubr.msk.f32.mxu0 %vm4703_vm8, %v4702_v10  ;;  %4403 = vmatpush3.msra.mxu1 %v3676_v29  ;;  %v3742_v29 = vld [vmem:[%s5758_s9 + $0x320] sm:$0xff] }
 0x689   : > { %4388 = vmatmul.mubr.msk.f32.vlgmr.msra.gmra.mxu0 %vm1006_vm7, %v2476_v30  ;;  %4404 = vmatprep.subr.mxu1 %v4702_v10  ;;  %v3752_v30 = vld [vmem:[%s5758_s9 + $0x368] sm:$0xff] }
 0x68a   : > { %4409 = vmatprep.subr.mxu0 %v4702_v10  ;;  %4405 = vmatpush3.msra.mxu1 %v3675_v31  ;;  %v3741_v31 = vld [vmem:[%s5758_s9 + $0x318] sm:$0xff] }
 0x68b   : > { %4406 = vmatprep.mubr.msk.f32.mxu1 %vm4703_vm8, %v4702_v10  ;;  %4410 = vmatpush3.msra.mxu0 %v3691_v32  ;;  %v3751_v32 = vld [vmem:[%s5758_s9 + $0x360] sm:$0xff] }
 0x68c   : > { %4407 = vmatmul.mubr.msk.f32.vlgmr.msra.gmra.mxu1 %vm1006_vm7, %v2559_v33  ;;  %4411 = vmatprep.subr.mxu0 %v4702_v10  ;;  %v3740_v33 = vld [vmem:[%s5758_s9 + $0x310] sm:$0xff] }
 0x68d   : > { %4428 = vmatprep.subr.mxu1 %v4702_v10  ;;  %4412 = vmatpush3.msra.mxu0 %v3690_v34  ;;  %v3750_v34 = vld [vmem:[%s5758_s9 + $0x358] sm:$0xff] }
 0x68e   : > { %4429 = vmatpush3.msra.mxu1 %v3700_v35  ;;  %4413 = vmatprep.subr.mxu0 %v4702_v10  ;;  %v3739_v35 = vld [vmem:[%s5758_s9 + $0x308] sm:$0xff] }
 0x68f   : > { %4430 = vmatprep.subr.mxu1 %v4702_v10  ;;  %4414 = vmatpush3.msra.mxu0 %v3689_v36  ;;  %v3749_v36 = vld [vmem:[%s5758_s9 + $0x350] sm:$0xff] }
 0x690   : > { %4431 = vmatpush3.msra.mxu1 %v3699_v37  ;;  %4415 = vmatprep.subr.mxu0 %v4702_v10  ;;  %v3738_v37 = vld [vmem:[%s5758_s9 + $0x300] sm:$0xff] }
 0x691   : > { %4432 = vmatprep.subr.mxu1 %v4702_v10  ;;  %4416 = vmatpush3.msra.mxu0 %v3688_v38  ;;  %v3748_v38 = vld [vmem:[%s5758_s9 + $0x348] sm:$0xff] }
 0x692   : > { %4433 = vmatpush3.msra.mxu1 %v3698_v39  ;;  %4417 = vmatprep.subr.mxu0 %v4702_v10  ;;  %v3140_v39 = vrot.slane %v5474_v2, 4 }
 0x693   : > { %4434 = vmatprep.subr.mxu1 %v4702_v10  ;;  %4418 = vmatpush3.msra.mxu0 %v3687_v40  ;;  %v3747_v40 = vld [vmem:[%s5758_s9 + $0x340] sm:$0xff] }
 0x694   : > { %4435 = vmatpush3.msra.mxu1 %v3697_v41  ;;  %4419 = vmatprep.subr.mxu0 %v4702_v10  ;;  %v3763_v41 = vld [vmem:[%s5758_s9 + $0x3b8] sm:$0xff] }
 0x695   : > { %4436 = vmatprep.subr.mxu1 %v4702_v10  ;;  %4420 = vmatpush3.msra.mxu0 %v3686_v42  ;;  %v3223_v42 = vrot.slane %v5474_v2, 5 }
 0x696   : > { %4437 = vmatpush3.msra.mxu1 %v3696_v43  ;;  %4421 = vmatprep.subr.mxu0 %v4702_v10  ;;  %v3762_v43 = vld [vmem:[%s5758_s9 + $0x3b0] sm:$0xff] }
 0x697   : > { %4438 = vmatprep.subr.mxu1 %v4702_v10  ;;  %4422 = vmatpush3.msra.mxu0 %v3685_v44  ;;  %v3772_v44 = vld [vmem:[%s5758_s9 + $0x3f8] sm:$0xff] }
 0x698   : > { %4439 = vmatpush3.msra.mxu1 %v3695_v45  ;;  %4423 = vmatprep.subr.mxu0 %v4702_v10  ;;  %v3761_v45 = vld [vmem:[%s5758_s9 + $0x3a8] sm:$0xff] }
 0x699   : > { %4440 = vmatprep.subr.mxu1 %v4702_v10  ;;  %4424 = vmatpush3.msra.mxu0 %v3684_v46  ;;  %v3771_v46 = vld [vmem:[%s5758_s9 + $0x3f0] sm:$0xff] }
 0x69a   : > { %4425 = vmatprep.mubr.msk.f32.mxu0 %vm4703_vm8, %v4702_v10  ;;  %4441 = vmatpush3.msra.mxu1 %v3694_v47  ;;  %v3760_v47 = vld [vmem:[%s5758_s9 + $0x3a0] sm:$0xff] }
 0x69b   : > { %4426 = vmatmul.mubr.msk.f32.vlgmr.msra.gmra.mxu0 %vm1006_vm7, %v2642_v48  ;;  %4442 = vmatprep.subr.mxu1 %v4702_v10  ;;  %v3770_v48 = vld [vmem:[%s5758_s9 + $0x3e8] sm:$0xff] }
 0x69c   : > { %4447 = vmatprep.subr.mxu0 %v4702_v10  ;;  %4443 = vmatpush3.msra.mxu1 %v3693_v49  ;;  %v3759_v49 = vld [vmem:[%s5758_s9 + $0x398] sm:$0xff] }
 0x69d   : > { %4444 = vmatprep.mubr.msk.f32.mxu1 %vm4703_vm8, %v4702_v10  ;;  %4448 = vmatpush3.msra.mxu0 %v3709_v50  ;;  %v3769_v50 = vld [vmem:[%s5758_s9 + $0x3e0] sm:$0xff] }
 0x69e   : > { %4445 = vmatmul.mubr.msk.f32.vlgmr.msra.gmra.mxu1 %vm1006_vm7, %v2725_v51  ;;  %4449 = vmatprep.subr.mxu0 %v4702_v10  ;;  %v3758_v51 = vld [vmem:[%s5758_s9 + $0x390] sm:$0xff] }
 0x69f   : > { %4466 = vmatprep.subr.mxu1 %v4702_v10  ;;  %4450 = vmatpush3.msra.mxu0 %v3708_v11  ;;  %v3768_v11 = vld [vmem:[%s5758_s9 + $0x3d8] sm:$0xff] }
 0x6a0   : > { %4467 = vmatpush3.msra.mxu1 %v3718_v52  ;;  %4451 = vmatprep.subr.mxu0 %v4702_v10  ;;  %v3757_v52 = vld [vmem:[%s5758_s9 + $0x388] sm:$0xff] }
 0x6a1   : > { %4468 = vmatprep.subr.mxu1 %v4702_v10  ;;  %4452 = vmatpush3.msra.mxu0 %v3707_v53  ;;  %v3767_v53 = vld [vmem:[%s5758_s9 + $0x3d0] sm:$0xff] }
 0x6a2   : > { %4469 = vmatpush3.msra.mxu1 %v3717_v55  ;;  %4453 = vmatprep.subr.mxu0 %v4702_v10  ;;  %v3756_v55 = vld [vmem:[%s5758_s9 + $0x380] sm:$0xff] }
 0x6a3   : > { %4470 = vmatprep.subr.mxu1 %v4702_v10  ;;  %4454 = vmatpush3.msra.mxu0 %v3706_v56  ;;  %v3766_v56 = vld [vmem:[%s5758_s9 + $0x3c8] sm:$0xff] }
 0x6a4   : > { %4471 = vmatpush3.msra.mxu1 %v3716_v57  ;;  %4455 = vmatprep.subr.mxu0 %v4702_v10  ;;  %v3306_v57 = vrot.slane %v5474_v2, 6 }
 0x6a5   : > { %4472 = vmatprep.subr.mxu1 %v4702_v10  ;;  %4456 = vmatpush3.msra.mxu0 %v3705_v58  ;;  %v3765_v58 = vld [vmem:[%s5758_s9 + $0x3c0] sm:$0xff] }
 0x6a6   : > { %4473 = vmatpush3.msra.mxu1 %v3715_v59  ;;  %4457 = vmatprep.subr.mxu0 %v4702_v10  ;;  %v3389_v59 = vrot.slane %v5474_v2, 7 }
 0x6a7   : > { %4474 = vmatprep.subr.mxu1 %v4702_v10  ;;  %4458 = vmatpush3.msra.mxu0 %v3704_v60  ;;  %v2135_v60 = vld [vmem:[%s5759_s10] sm:$0x1] }
 0x6a8   : > { %4475 = vmatpush3.msra.mxu1 %v3714_v61  ;;  %4459 = vmatprep.subr.mxu0 %v4702_v10 }
 0x6a9   : > { %4476 = vmatprep.subr.mxu1 %v4702_v10  ;;  %4460 = vmatpush3.msra.mxu0 %v3703_v62 }
 0x6aa   : > { %4477 = vmatpush3.msra.mxu1 %v3713_v63  ;;  %4461 = vmatprep.subr.mxu0 %v4702_v10 }
 0x6ab   : > { %4478 = vmatprep.subr.mxu1 %v4702_v10  ;;  %4462 = vmatpush3.msra.mxu0 %v3702_v0 }
 0x6ac   : > { %4463 = vmatprep.mubr.msk.f32.mxu0 %vm4703_vm8, %v4702_v10  ;;  %4479 = vmatpush3.msra.mxu1 %v3712_v1 }
 0x6ad   : > { %4464 = vmatmul.mubr.msk.f32.vlgmr.msra.gmra.mxu0 %vm1006_vm7, %v5474_v2  ;;  %4480 = vmatprep.subr.mxu1 %v4702_v10 }
 0x6ae   : > { %4485 = vmatprep.subr.mxu0 %v4702_v10  ;;  %4481 = vmatpush3.msra.mxu1 %v3711_v3 }
 0x6af   : > { %4482 = vmatprep.mubr.msk.f32.mxu1 %vm4703_vm8, %v4702_v10  ;;  %4486 = vmatpush3.msra.mxu0 %v3727_v4 }
 0x6b0   : > { %4483 = vmatmul.mubr.msk.f32.vlgmr.msra.gmra.mxu1 %vm1006_vm7, %v2891_v54  ;;  %4487 = vmatprep.subr.mxu0 %v4702_v10 }
 0x6b1   : > { %4504 = vmatprep.subr.mxu1 %v4702_v10  ;;  %4488 = vmatpush3.msra.mxu0 %v3726_v5 }
 0x6b2   : > { %4505 = vmatpush3.msra.mxu1 %v3736_v6  ;;  %4489 = vmatprep.subr.mxu0 %v4702_v10 }
 0x6b3   : > { %4506 = vmatprep.subr.mxu1 %v4702_v10  ;;  %4490 = vmatpush3.msra.mxu0 %v3725_v12 }
 0x6b4   : > { %4507 = vmatpush3.msra.mxu1 %v3735_v13  ;;  %4491 = vmatprep.subr.mxu0 %v4702_v10 }
 0x6b5   : > { %4508 = vmatprep.subr.mxu1 %v4702_v10  ;;  %4492 = vmatpush3.msra.mxu0 %v3724_v14 }
 0x6b6   : > { %4509 = vmatpush3.msra.mxu1 %v3734_v7  ;;  %4493 = vmatprep.subr.mxu0 %v4702_v10 }
 0x6b7   : > { %4510 = vmatprep.subr.mxu1 %v4702_v10  ;;  %4494 = vmatpush3.msra.mxu0 %v3723_v8 }
 0x6b8   : > { %4511 = vmatpush3.msra.mxu1 %v3733_v9  ;;  %4495 = vmatprep.subr.mxu0 %v4702_v10 }
 0x6b9   : > { %4512 = vmatprep.subr.mxu1 %v4702_v10  ;;  %4496 = vmatpush3.msra.mxu0 %v3722_v15 }
 0x6ba   : > { %4513 = vmatpush3.msra.mxu1 %v3732_v16  ;;  %4497 = vmatprep.subr.mxu0 %v4702_v10 }
 0x6bb   : > { %4514 = vmatprep.subr.mxu1 %v4702_v10  ;;  %4498 = vmatpush3.msra.mxu0 %v3721_v17 }
 0x6bc   : > { %4515 = vmatpush3.msra.mxu1 %v3731_v18  ;;  %4499 = vmatprep.subr.mxu0 %v4702_v10 }
 0x6bd   : > { %4516 = vmatprep.subr.mxu1 %v4702_v10  ;;  %4500 = vmatpush3.msra.mxu0 %v3720_v19 }
 0x6be   : > { %4501 = vmatprep.mubr.msk.f32.mxu0 %vm4703_vm8, %v4702_v10  ;;  %4517 = vmatpush3.msra.mxu1 %v3730_v20 }
 0x6bf   : > { %4502 = vmatmul.mubr.msk.f32.vlgmr.msra.gmra.mxu0 %vm1006_vm7, %v2974_v21  ;;  %4518 = vmatprep.subr.mxu1 %v4702_v10 }
 0x6c0   : > { %4523 = vmatprep.subr.mxu0 %v4702_v10  ;;  %4519 = vmatpush3.msra.mxu1 %v3729_v22 }
 0x6c1   : > { %4520 = vmatprep.mubr.msk.f32.mxu1 %vm4703_vm8, %v4702_v10  ;;  %4524 = vmatpush3.msra.mxu0 %v3745_v23 }
 0x6c2   : > { %4521 = vmatmul.mubr.msk.f32.vlgmr.msra.gmra.mxu1 %vm1006_vm7, %v3057_v24  ;;  %4525 = vmatprep.subr.mxu0 %v4702_v10 }
 0x6c3   : > { %4542 = vmatprep.subr.mxu1 %v4702_v10  ;;  %4526 = vmatpush3.msra.mxu0 %v3744_v25 }
 0x6c4   : > { %4543 = vmatpush3.msra.mxu1 %v3754_v26  ;;  %4527 = vmatprep.subr.mxu0 %v4702_v10 }
 0x6c5   : > { %4544 = vmatprep.subr.mxu1 %v4702_v10  ;;  %4528 = vmatpush3.msra.mxu0 %v3743_v27 }
 0x6c6   : > { %4545 = vmatpush3.msra.mxu1 %v3753_v28  ;;  %4529 = vmatprep.subr.mxu0 %v4702_v10 }
 0x6c7   : > { %4546 = vmatprep.subr.mxu1 %v4702_v10  ;;  %4530 = vmatpush3.msra.mxu0 %v3742_v29 }
 0x6c8   : > { %4547 = vmatpush3.msra.mxu1 %v3752_v30  ;;  %4531 = vmatprep.subr.mxu0 %v4702_v10 }
 0x6c9   : > { %4548 = vmatprep.subr.mxu1 %v4702_v10  ;;  %4532 = vmatpush3.msra.mxu0 %v3741_v31 }
 0x6ca   : > { %4549 = vmatpush3.msra.mxu1 %v3751_v32  ;;  %4533 = vmatprep.subr.mxu0 %v4702_v10 }
 0x6cb   : > { %4550 = vmatprep.subr.mxu1 %v4702_v10  ;;  %4534 = vmatpush3.msra.mxu0 %v3740_v33 }
 0x6cc   : > { %4551 = vmatpush3.msra.mxu1 %v3750_v34  ;;  %4535 = vmatprep.subr.mxu0 %v4702_v10 }
 0x6cd   : > { %4552 = vmatprep.subr.mxu1 %v4702_v10  ;;  %4536 = vmatpush3.msra.mxu0 %v3739_v35 }
 0x6ce   : > { %4553 = vmatpush3.msra.mxu1 %v3749_v36  ;;  %4537 = vmatprep.subr.mxu0 %v4702_v10 }
 0x6cf   : > { %4554 = vmatprep.subr.mxu1 %v4702_v10  ;;  %4538 = vmatpush3.msra.mxu0 %v3738_v37 }
 0x6d0   : > { %4539 = vmatprep.mubr.msk.f32.mxu0 %vm4703_vm8, %v4702_v10  ;;  %4555 = vmatpush3.msra.mxu1 %v3748_v38 }
 0x6d1   : > { %4540 = vmatmul.mubr.msk.f32.vlgmr.msra.gmra.mxu0 %vm1006_vm7, %v3140_v39  ;;  %4556 = vmatprep.subr.mxu1 %v4702_v10 }
 0x6d2   : > { %4561 = vmatprep.subr.mxu0 %v4702_v10  ;;  %4557 = vmatpush3.msra.mxu1 %v3747_v40 }
 0x6d3   : > { %4558 = vmatprep.mubr.msk.f32.mxu1 %vm4703_vm8, %v4702_v10  ;;  %4562 = vmatpush3.msra.mxu0 %v3763_v41 }
 0x6d4   : > { %4559 = vmatmul.mubr.msk.f32.vlgmr.msra.gmra.mxu1 %vm1006_vm7, %v3223_v42  ;;  %4563 = vmatprep.subr.mxu0 %v4702_v10 }
 0x6d5   : > { %4580 = vmatprep.subr.mxu1 %v4702_v10  ;;  %4564 = vmatpush3.msra.mxu0 %v3762_v43 }
 0x6d6   : > { %4581 = vmatpush3.msra.mxu1 %v3772_v44  ;;  %4565 = vmatprep.subr.mxu0 %v4702_v10 }
 0x6d7   : > { %4582 = vmatprep.subr.mxu1 %v4702_v10  ;;  %4566 = vmatpush3.msra.mxu0 %v3761_v45 }
 0x6d8   : > { %4583 = vmatpush3.msra.mxu1 %v3771_v46  ;;  %4567 = vmatprep.subr.mxu0 %v4702_v10 }
 0x6d9   : > { %4584 = vmatprep.subr.mxu1 %v4702_v10  ;;  %4568 = vmatpush3.msra.mxu0 %v3760_v47 }
 0x6da   : > { %4585 = vmatpush3.msra.mxu1 %v3770_v48  ;;  %4569 = vmatprep.subr.mxu0 %v4702_v10 }
 0x6db   : > { %4586 = vmatprep.subr.mxu1 %v4702_v10  ;;  %4570 = vmatpush3.msra.mxu0 %v3759_v49 }
 0x6dc   : > { %4587 = vmatpush3.msra.mxu1 %v3769_v50  ;;  %4571 = vmatprep.subr.mxu0 %v4702_v10 }
 0x6dd   : > { %4588 = vmatprep.subr.mxu1 %v4702_v10  ;;  %4572 = vmatpush3.msra.mxu0 %v3758_v51 }
 0x6de   : > { %4589 = vmatpush3.msra.mxu1 %v3768_v11  ;;  %4573 = vmatprep.subr.mxu0 %v4702_v10 }
 0x6df   : > { %4590 = vmatprep.subr.mxu1 %v4702_v10  ;;  %4574 = vmatpush3.msra.mxu0 %v3757_v52 }
 0x6e0   : > { %4591 = vmatpush3.msra.mxu1 %v3767_v53  ;;  %4575 = vmatprep.subr.mxu0 %v4702_v10 }
 0x6e1   : > { %4592 = vmatprep.subr.mxu1 %v4702_v10  ;;  %4576 = vmatpush3.msra.mxu0 %v3756_v55 }
 0x6e2   : > { %4577 = vmatprep.mubr.msk.f32.mxu0 %vm4703_vm8, %v4702_v10  ;;  %4593 = vmatpush3.msra.mxu1 %v3766_v56 }
 0x6e3   : > { %4578 = vmatmul.mubr.msk.f32.vlgmr.msra.gmra.mxu0 %vm1006_vm7, %v3306_v57  ;;  %4594 = vmatprep.subr.mxu1 %v4702_v10 }
 0x6e4   : > { %4595 = vmatpush3.msra.mxu1 %v3765_v58  ;;  %4596 = vmatprep.mubr.msk.f32.mxu1 %vm4703_vm8, %v4702_v10 }
 0x6e5   : > { %4597 = vmatmul.mubr.msk.f32.vlgmr.msra.gmra.mxu1 %vm1006_vm7, %v3389_v59 }
 0x727   : > { %v2213_v61 = vpop.f32.mrf.mxu0 }
 0x728   : > { %v2217_v62 = vadd.f32 %v2213_v61, %v2135_v60 }
 0x729   : > { %v4313_v63 = vpop.f32.mrf.mxu0  ;;  %v2296_v0 = vpop.f32.mrf.mxu1 }
 0x72a   : > { %v2300_v1 = vadd.f32 %v2296_v0, %v2217_v62 }
 0x72b   : > { %v4332_v3 = vpop.f32.mrf.mxu1 }
 0x737   : > { %v2379_v4 = vpop.f32.mrf.mxu0 }
 0x738   : > { %v2383_v54 = vadd.f32 %v2379_v4, %v2300_v1 }
 0x739   : > { %v4351_v5 = vpop.f32.mrf.mxu0 }
 0x73a   : > { %v2462_v2 = vpop.f32.mrf.mxu1 }
 0x73b   : > { %v2466_v6 = vadd.f32 %v2462_v2, %v2383_v54 }
 0x73c   : > { %v4370_v12 = vpop.f32.mrf.mxu1 }
 0x749   : > { %v2545_v13 = vpop.f32.mrf.mxu0 }
 0x74a   : > { %v2549_v10 = vadd.f32 %v2545_v13, %v2466_v6 }
 0x74b   : > { %v4389_v14 = vpop.f32.mrf.mxu0 }
 0x74c   : > { %v2628_v7 = vpop.f32.mrf.mxu1 }
 0x74d   : > { %v2632_v8 = vadd.f32 %v2628_v7, %v2549_v10 }
 0x74e   : > { %v4408_v9 = vpop.f32.mrf.mxu1 }
 0x75b   : > { %v2711_v15 = vpop.f32.mrf.mxu0 }
 0x75c   : > { %v2715_v27 = vadd.f32 %v2711_v15, %v2632_v8 }
 0x75d   : > { %v4427_v16 = vpop.f32.mrf.mxu0 }
 0x75e   : > { %v2794_v17 = vpop.f32.mrf.mxu1 }
 0x75f   : > { %v2798_v28 = vadd.f32 %v2794_v17, %v2715_v27 }
 0x760   : > { %v4446_v18 = vpop.f32.mrf.mxu1 }
 0x76d   : > { %v2877_v19 = vpop.f32.mrf.mxu0 }
 0x76e   : > { %v2881_v30 = vadd.f32 %v2877_v19, %v2798_v28 }
 0x76f   : > { %v4465_v20 = vpop.f32.mrf.mxu0 }
 0x770   : > { %v2960_v21 = vpop.f32.mrf.mxu1 }
 0x771   : > { %v2964_v33 = vadd.f32 %v2960_v21, %v2881_v30 }
 0x772   : > { %v4484_v22 = vpop.f32.mrf.mxu1 }
 0x77f   : > { %v3043_v23 = vpop.f32.mrf.mxu0 }
 0x780   : > { %v3047_v35 = vadd.f32 %v3043_v23, %v2964_v33 }
 0x781   : > { %v4503_v24 = vpop.f32.mrf.mxu0 }
 0x782   : > { %v3126_v25 = vpop.f32.mrf.mxu1 }
 0x783   : > { %v3130_v36 = vadd.f32 %v3126_v25, %v3047_v35 }
 0x784   : > { %v4522_v26 = vpop.f32.mrf.mxu1 }
 0x791   : > { %v3209_v29 = vpop.f32.mrf.mxu0 }
 0x792   : > { %v3213_v37 = vadd.f32 %v3209_v29, %v3130_v36 }
 0x793   : > { %v4541_v31 = vpop.f32.mrf.mxu0 }
 0x794   : > { %v3292_v32 = vpop.f32.mrf.mxu1 }
 0x795   : > { %v3296_v38 = vadd.f32 %v3292_v32, %v3213_v37 }
 0x796   : > { %v4560_v34 = vpop.f32.mrf.mxu1 }
 0x7a3   : > { %v3375_v39 = vpop.f32.mrf.mxu0 }
 0x7a4   : > { %v3379_v40 = vadd.f32 %v3375_v39, %v3296_v38 }
 0x7a5   : > { %v4579_v41 = vpop.f32.mrf.mxu0  ;;  %v3458_v42 = vpop.f32.mrf.mxu1 }
 0x7a6   : > { %v3462_v43 = vadd.f32 %v3458_v42, %v3379_v40 }
 0x7a7   : > { %v4598_v44 = vpop.f32.mrf.mxu1 }
 0x7a8   : > { %3464 = vst.msk [vmem:[%s378_s13] sm:$0x1] %vm3463_vm9, %v3462_v43 }
 0x7a9   : > { %4653 = shalt.err (!%p4650_p3)
}
 0x7aa   : > { %s4654_s12 = scalar_lea.hbm %s5714_s22, 16  ;;  %s4658_s15 = scalar_lea.hbm %s5760_s11, 32 }
 0x7ab   : > { %p4655_p4 = scmp.ne.s32.totalorder %s5714_s22, %s4654_s12  ;;  %p4659_p9 = scmp.lt.s32.totalorder %s5714_s22, %s5760_s11 }
 0x7ac   : > { %p4660_p10 = scmp.lt.s32.totalorder %s4658_s15, %s4654_s12 }
 0x7ad   : > { %p4656_p7 = pnand %p4655_p4, %p4803_p5 }
 0x7ae   : > { %p4661_p11 = por %p4660_p10, %p4659_p9 }
 0x7af   : > { %p4657_p8 = pneg %p4656_p7 }
 0x7b1   : > { %p4662_p12 = pnand %p4661_p11, %p4657_p8 }
 0x7b3   : > { %4665 = shalt.err (!%p4662_p12)
}
 0x7b4   : > { %4599 = dma.vmem_to_hbm [thread:$0]  (%p4803_p5), %s3479_s14, 16, %s5714_s22, %s3466_s24  }
 0x7b5 PF: > { %p4605_p13 = scmp.ge.s32.totalorder %s4700_s20, 2  ;;  %s3490_s0 = sand.u32 1, %s4688_s17  }
 0x7b6   : > { %s3491_s25 = scalar_lea.sflag [#allocation3], %s3490_s0 }
 0x7b7   : > { %p4602_p0 = pnand %p4605_p13, %p4807_p6 }
 0x7b9   : > { %p4603_p1 = pneg %p4602_p0 }
 0x7bb   : > { %4683 = dma.done.wait (%p4603_p1), %s3491_s25, 16  }
 0x7bc   : > { %4685 = vsyncadd (%p4603_p1), %s3491_s25, 4294967280  ;;  %p21_p2 = scmp.ge.s32.totalorder %s4790_s23, 4   ;;  %s5765_s17 = smov %s4692_s18 }
 0x7bd   : > { %s5766_s18 = smov %s4696_s19  ;;  %s5767_s19 = smov %s4801_s26 }
 0x7be   : > { %s5768_s20 = smov %s4790_s23  ;;  %23 = sbr.rel (!%p21_p2) target bundleno = 5 (0x5), region = 122 }
 0x7c3   :  { %3495 = vsyncpa [#allocation3], 1 }
 0x7c4   :  { %3497 = vsyncpa [#allocation3 + $0x1], 1 }

</bundles_post_ra>
